<compile_context>
chip_gen: v5e
topology: v5e:2x2
jax: 0.10.0
libtpu: 0.0.40
codegen_flags: <defaults>
</compile_context>

<pallas_src>
import functools

import jax
import jax.numpy as jnp
from jax import lax
from jax.experimental import pallas as pl
from jax.experimental.pallas import tpu as pltpu


def _cbam_kernel(x_ref, w1b_ref, w2b_ref, wsp_ref, o_ref, *, BB, C, H, W, ksize):
    """One batch-block (BB batch elements) per grid step.

    x_ref  : (BB*C, HW)        VMEM  lane-dense feature rows (row = b*C + c)
    w1b_ref: (BB*Cr, BB*C)     VMEM  block-diagonal first 1x1 conv of shared MLP
    w2b_ref: (BB*C, BB*Cr)     VMEM  block-diagonal second 1x1 conv of shared MLP
    wsp_ref: (2*k*k,)          SMEM  7x7 spatial conv weights [avg taps | max taps]
    o_ref  : (BB*C, HW)        VMEM
    """
    HW = H * W
    pad = (ksize - 1) // 2
    kk = ksize * ksize

    x = x_ref[...].astype(jnp.float32)                       # (BB*C, HW)

    # ---------------- Channel attention (pool -> batched block-diag MLP) ----
    avg_col = jnp.mean(x, axis=1, keepdims=True)             # (BB*C, 1)
    max_col = jnp.max(x, axis=1, keepdims=True)              # (BB*C, 1)
    pooled = jnp.concatenate([avg_col, max_col], axis=1)     # (BB*C, 2)

    w1b = w1b_ref[...]                                        # (BB*Cr, BB*C)
    w2b = w2b_ref[...]                                        # (BB*C, BB*Cr)

    # One matmul pair for the whole block (avg & max as the two RHS columns).
    h = jnp.dot(w1b, pooled, preferred_element_type=jnp.float32)   # (BB*Cr, 2)
    h = jnp.maximum(h, 0.0)                                         # ReLU
    mo = jnp.dot(w2b, h, preferred_element_type=jnp.float32)        # (BB*C, 2)
    combined = mo[:, 0:1] + mo[:, 1:2]                              # 'add' combination
    ch_att = jax.nn.sigmoid(combined)                               # (BB*C, 1)

    x_ch = x * ch_att                                                # gated map

    # ---------------- Spatial pooling over C per batch ----------------------
    # Stack all avg planes then all max planes -> (2*BB, HW) so every roll /
    # multiply below works on a sublane-fuller tile.
    avg_planes = []
    max_planes = []
    for b in range(BB):
        xb = x_ch[b * C:(b + 1) * C]                         # (C, HW)
        avg_planes.append(jnp.mean(xb, axis=0, keepdims=True))
        max_planes.append(jnp.max(xb, axis=0, keepdims=True))
    stacked = jnp.concatenate(avg_planes + max_planes, axis=0)   # (2*BB, HW)

    # Row selector: rows [0, BB) hold avg planes, rows [BB, 2*BB) hold max planes.
    row_is_avg = lax.broadcasted_iota(jnp.int32, (2 * BB, 1), 0) < BB

    # Hoisted boundary masks on the flattened index.
    p_idx = lax.broadcasted_iota(jnp.int32, (1, HW), 1)      # flat index p = y*W + x
    if (W & (W - 1)) == 0:
        x_idx = p_idx & (W - 1)                              # x = p mod W (power of 2)
    else:
        x_idx = p_idx % W

    row_mask = {}
    col_mask = {}
    for d in range(-pad, pad + 1):
        if d == 0:
            row_mask[d] = None
            col_mask[d] = None
        elif d > 0:
            row_mask[d] = (p_idx < (H - d) * W).astype(jnp.float32)   # y + d < H
            col_mask[d] = (x_idx < (W - d)).astype(jnp.float32)       # x + d < W
        else:
            row_mask[d] = (p_idx >= (-d) * W).astype(jnp.float32)     # y + d >= 0
            col_mask[d] = (x_idx >= (-d)).astype(jnp.float32)         # x + d >= 0

    # ---------------- 7x7 conv via lane rolls (row mask applied per row offset)
    acc = jnp.zeros((2 * BB, HW), jnp.float32)
    for ki in range(ksize):
        di = ki - pad
        if di == 0:
            base = stacked
        else:
            base = pltpu.roll(stacked, shift=(-di * W) % HW, axis=1)
        rm = row_mask[di]
        if rm is not None:
            base = base * rm                                  # once per row offset
        for kj in range(ksize):
            dj = kj - pad
            if dj == 0:
                sh = base
            else:
                sh = pltpu.roll(base, shift=(-dj) % HW, axis=1)
            w_a = wsp_ref[ki * ksize + kj]                    # SMEM scalar (avg plane)
            w_m = wsp_ref[kk + ki * ksize + kj]               # SMEM scalar (max plane)
            w_col = jnp.where(row_is_avg, w_a, w_m)           # (2*BB, 1)
            contrib = sh * w_col                              # (2*BB, HW)
            cm = col_mask[dj]
            if cm is not None:
                contrib = contrib * cm
            acc = acc + contrib

    conv = acc[0:BB] + acc[BB:2 * BB]                         # (BB, HW): avg + max planes
    sp_att = jax.nn.sigmoid(conv)                             # (BB, HW)

    # ---------------- Final gating + single lane-dense store ----------------
    outs = []
    for b in range(BB):
        outs.append(x_ch[b * C:(b + 1) * C] * sp_att[b:b + 1])   # (C, HW)
    o_ref[...] = jnp.concatenate(outs, axis=0).astype(o_ref.dtype)


def _choose_batch_block(B, C, HW, itemsize, budget_bytes=8 << 20):
    """Largest batch-block (divisor of B) whose VMEM footprint fits the budget.

    Blocks smaller than the whole batch must keep BB*C a multiple of 8 and HW a
    multiple of 128 (BlockSpec divisibility); the whole-array block is exempt.
    """
    for cand in range(B, 0, -1):
        if B % cand:
            continue
        ok_shape = (cand == B) or ((cand * C) % 8 == 0 and HW % 128 == 0)
        # rough footprint: in + out, double-buffered, plus f32 working copies
        footprint = cand * C * HW * max(itemsize, 4) * 6
        if ok_shape and footprint <= budget_bytes:
            return cand
    return B  # fall back to single-shot full block


@functools.partial(jax.jit, static_argnames=("spatial_kernel_size",))
def cbam_pallas(x, w1, w2, w_spatial, spatial_kernel_size=7):
    B, C, H, W = x.shape
    Cr = w1.shape[0]
    HW = H * W
    K = spatial_kernel_size
    pad = (K - 1) // 2
    # Roll+mask wrap handling assumes a single row/col mask covers each tap.
    assert pad < H and pad < W, "spatial kernel padding must be < H and < W"

    BB = _choose_batch_block(B, C, HW, x.dtype.itemsize)
    G = B // BB

    # Lane-dense rows: H*W on the 128-lane axis, batch*channel on sublanes.
    x_rows = x.reshape(B * C, HW)
    wsp_flat = w_spatial.reshape(-1).astype(jnp.float32)      # (2*k*k,)

    # Block-diagonal shared-MLP weights: one matmul pair serves the whole block.
    eye = jnp.eye(BB, dtype=jnp.float32)
    w1b = jnp.kron(eye, w1.astype(jnp.float32))               # (BB*Cr, BB*C)
    w2b = jnp.kron(eye, w2.astype(jnp.float32))               # (BB*C, BB*Cr)

    kernel = functools.partial(_cbam_kernel, BB=BB, C=C, H=H, W=W, ksize=K)
    out_rows = pl.pallas_call(
        kernel,
        out_shape=jax.ShapeDtypeStruct((B * C, HW), x.dtype),
        grid_spec=pltpu.PrefetchScalarGridSpec(
            num_scalar_prefetch=0,
            grid=(G,),
            in_specs=[
                pl.BlockSpec((BB * C, HW), lambda g: (g, 0)),
                pl.BlockSpec((BB * Cr, BB * C), lambda g: (0, 0)),
                pl.BlockSpec((BB * C, BB * Cr), lambda g: (0, 0)),
                pl.BlockSpec(memory_space=pltpu.MemorySpace.SMEM),
            ],
            out_specs=pl.BlockSpec((BB * C, HW), lambda g: (g, 0)),
        ),
        compiler_params=pltpu.CompilerParams(
            dimension_semantics=("parallel",)),   # shard batch-blocks across v7x TCs
    )(x_rows, w1b, w2b, wsp_flat)
    return out_rows.reshape(B, C, H, W)


def cbam_reference(x, w1, w2, w_spatial):
    """Pure-JAX reference matching the PyTorch forward pass."""
    avg_p = jnp.mean(x, axis=(2, 3))                    # (B, C)
    max_p = jnp.max(x, axis=(2, 3))                     # (B, C)

    def mlp(v):                                         # (B, C)
        h = jnp.maximum(v @ w1.T, 0.0)                  # (B, Cr)
        return h @ w2.T                                 # (B, C)

    ch_att = jax.nn.sigmoid(mlp(avg_p) + mlp(max_p))    # 'add' combination
    x_ch = x * ch_att[:, :, None, None]

    avg_sp = jnp.mean(x_ch, axis=1, keepdims=True)
    max_sp = jnp.max(x_ch, axis=1, keepdims=True)
    pooled = jnp.concatenate([avg_sp, max_sp], axis=1)  # (B, 2, H, W)
    conv = lax.conv_general_dilated(
        pooled, w_spatial, window_strides=(1, 1), padding="SAME",
        dimension_numbers=("NCHW", "OIHW", "NCHW"))
    sp_att = jax.nn.sigmoid(conv)
    return x_ch * sp_att


if __name__ == "__main__":
    # Module config: gate_channels=4, reduction_ratio=16 -> reduced=max(1, 4//16)=1,
    # spatial_kernel_size=7, channel_combination='add'.
    B, C, H, W = 2, 4, 16, 16
    Cr = max(1, C // 16)
    K = 7

    key = jax.random.PRNGKey(0)
    kx, k1, k2, k3 = jax.random.split(key, 4)

    x = jax.random.normal(kx, (B, C, H, W), dtype=jnp.float32)
    # Conv2d(C, Cr, 1, bias=False).weight -> (Cr, C, 1, 1), squeezed to (Cr, C)
    w1 = jax.random.normal(k1, (Cr, C), dtype=jnp.float32) * 0.3
    # Conv2d(Cr, C, 1, bias=False).weight -> (C, Cr, 1, 1), squeezed to (C, Cr)
    w2 = jax.random.normal(k2, (C, Cr), dtype=jnp.float32) * 0.3
    # Conv2d(2, 1, 7, padding=3, bias=False).weight -> (1, 2, 7, 7)
    w_spatial = jax.random.normal(k3, (1, 2, K, K), dtype=jnp.float32) * 0.1

    out = cbam_pallas(x, w1, w2, w_spatial, spatial_kernel_size=K)
    out = jax.block_until_ready(out)

    ref = cbam_reference(x, w1, w2, w_spatial)
    assert out.shape == (B, C, H, W)
    assert jnp.allclose(out, ref, rtol=1e-4, atol=1e-5), (
        "Pallas CBAM output mismatch vs reference")

    print("KERNEL_OK")
</pallas_src>

<mosaic_0001>
module attributes {stable_mosaic.version = 11 : i64} {
  func.func @_cbam_kernel(%arg0: i32, %arg1: memref<8x256xf32, #tpu.memory_space<vmem>>, %arg2: memref<2x8xf32, #tpu.memory_space<vmem>>, %arg3: memref<8x2xf32, #tpu.memory_space<vmem>>, %arg4: memref<98xf32, #tpu.memory_space<smem>>, %arg5: memref<8x256xf32, #tpu.memory_space<vmem>>) attributes {dimension_semantics = [#tpu.dimension_semantics<parallel>], iteration_bounds = array<i64: 1>, scalar_prefetch = 0 : i64, scratch_operands = 0 : i64, tpu.core_type = #tpu.core_type<tc>, window_params = [{transform_indices = @transform_0, window_bounds = array<i64: 8, 256>}, {pipeline_mode = #tpu.pipeline_mode<synchronous>, transform_indices = @transform_1, window_bounds = array<i64: 2, 8>}, {pipeline_mode = #tpu.pipeline_mode<synchronous>, transform_indices = @transform_2, window_bounds = array<i64: 8, 2>}, {transform_indices = @transform_3, window_bounds = array<i64: 98>}, {transform_indices = @transform_4, window_bounds = array<i64: 8, 256>}]} {
    %c0 = arith.constant 0 : index
    %c0_0 = arith.constant 0 : index
    %0 = vector.load %arg1[%c0, %c0_0] : memref<8x256xf32, #tpu.memory_space<vmem>>, vector<8x256xf32>
    %cst = arith.constant dense<0.000000e+00> : vector<8xf32>
    %1 = vector.multi_reduction <add>, %0, %cst [1] : vector<8x256xf32> to vector<8xf32>
    %2 = vector.shape_cast %1 : vector<8xf32> to vector<8x1xf32>
    %cst_1 = arith.constant 2.560000e+02 : f32
    %3 = vector.broadcast %cst_1 : f32 to vector<8x1xf32>
    %4 = arith.divf %2, %3 : vector<8x1xf32>
    %cst_2 = arith.constant dense<0xFF800000> : vector<8xf32>
    %5 = vector.multi_reduction <maximumf>, %0, %cst_2 [1] : vector<8x256xf32> to vector<8xf32>
    %6 = vector.shape_cast %5 : vector<8xf32> to vector<8x1xf32>
    %7 = tpu.concatenate %4, %6 in 1 : vector<8x1xf32>, vector<8x1xf32> -> vector<8x2xf32>
    %c0_3 = arith.constant 0 : index
    %c0_4 = arith.constant 0 : index
    %8 = vector.load %arg2[%c0_3, %c0_4] : memref<2x8xf32, #tpu.memory_space<vmem>>, vector<2x8xf32>
    %c0_5 = arith.constant 0 : index
    %c0_6 = arith.constant 0 : index
    %9 = vector.load %arg3[%c0_5, %c0_6] : memref<8x2xf32, #tpu.memory_space<vmem>>, vector<8x2xf32>
    %cst_7 = arith.constant dense<0.000000e+00> : vector<2x2xf32>
    %10 = tpu.matmul %8, %7, %cst_7 {dimension_numbers = #tpu.dot_dimension_numbers<[1], [0], [0], [1], [0, 0, 1, 1], [], []>} : vector<2x8xf32>, vector<8x2xf32>, vector<2x2xf32> -> vector<2x2xf32>
    %cst_8 = arith.constant 0.000000e+00 : f32
    %11 = vector.broadcast %cst_8 : f32 to vector<2x2xf32>
    %12 = arith.maximumf %10, %11 : vector<2x2xf32>
    %cst_9 = arith.constant dense<0.000000e+00> : vector<8x2xf32>
    %13 = tpu.matmul %9, %12, %cst_9 {dimension_numbers = #tpu.dot_dimension_numbers<[1], [0], [0], [1], [0, 0, 1, 1], [], []>} : vector<8x2xf32>, vector<2x2xf32>, vector<8x2xf32> -> vector<8x2xf32>
    %14 = vector.extract_strided_slice %13 {offsets = [0, 0], sizes = [8, 1], strides = [1, 1]} : vector<8x2xf32> to vector<8x1xf32>
    %15 = vector.extract_strided_slice %13 {offsets = [0, 1], sizes = [8, 1], strides = [1, 1]} : vector<8x2xf32> to vector<8x1xf32>
    %16 = arith.addf %14, %15 : vector<8x1xf32>
    %17 = arith.negf %16 : vector<8x1xf32>
    %18 = math.exp %17 : vector<8x1xf32>
    %cst_10 = arith.constant 1.000000e+00 : f32
    %19 = vector.broadcast %cst_10 : f32 to vector<8x1xf32>
    %20 = arith.addf %19, %18 : vector<8x1xf32>
    %21 = arith.divf %19, %20 : vector<8x1xf32>
    %22 = vector.broadcast %21 : vector<8x1xf32> to vector<8x256xf32>
    %23 = arith.mulf %0, %22 : vector<8x256xf32>
    %24 = vector.extract_strided_slice %23 {offsets = [0, 0], sizes = [4, 256], strides = [1, 1]} : vector<8x256xf32> to vector<4x256xf32>
    %cst_11 = arith.constant dense<0.000000e+00> : vector<256xf32>
    %25 = vector.multi_reduction <add>, %24, %cst_11 [0] : vector<4x256xf32> to vector<256xf32>
    %26 = vector.shape_cast %25 : vector<256xf32> to vector<1x256xf32>
    %cst_12 = arith.constant 4.000000e+00 : f32
    %27 = vector.broadcast %cst_12 : f32 to vector<1x256xf32>
    %28 = arith.divf %26, %27 : vector<1x256xf32>
    %cst_13 = arith.constant dense<0xFF800000> : vector<256xf32>
    %29 = vector.multi_reduction <maximumf>, %24, %cst_13 [0] : vector<4x256xf32> to vector<256xf32>
    %30 = vector.shape_cast %29 : vector<256xf32> to vector<1x256xf32>
    %31 = vector.extract_strided_slice %23 {offsets = [4, 0], sizes = [4, 256], strides = [1, 1]} : vector<8x256xf32> to vector<4x256xf32>
    %cst_14 = arith.constant dense<0.000000e+00> : vector<256xf32>
    %32 = vector.multi_reduction <add>, %31, %cst_14 [0] : vector<4x256xf32> to vector<256xf32>
    %33 = vector.shape_cast %32 : vector<256xf32> to vector<1x256xf32>
    %cst_15 = arith.constant 4.000000e+00 : f32
    %34 = vector.broadcast %cst_15 : f32 to vector<1x256xf32>
    %35 = arith.divf %33, %34 : vector<1x256xf32>
    %cst_16 = arith.constant dense<0xFF800000> : vector<256xf32>
    %36 = vector.multi_reduction <maximumf>, %31, %cst_16 [0] : vector<4x256xf32> to vector<256xf32>
    %37 = vector.shape_cast %36 : vector<256xf32> to vector<1x256xf32>
    %38 = tpu.concatenate %28, %35, %30, %37 in 0 : vector<1x256xf32>, vector<1x256xf32>, vector<1x256xf32>, vector<1x256xf32> -> vector<4x256xf32>
    %39 = tpu.iota {dimensions = array<i32: 0>} : vector<4x1xi32>
    %c2_i32 = arith.constant 2 : i32
    %40 = vector.broadcast %c2_i32 : i32 to vector<4x1xi32>
    %41 = arith.cmpi slt, %39, %40 : vector<4x1xi32>
    %42 = tpu.iota {dimensions = array<i32: 1>} : vector<1x256xi32>
    %c15_i32 = arith.constant 15 : i32
    %43 = vector.broadcast %c15_i32 : i32 to vector<1x256xi32>
    %44 = arith.andi %42, %43 : vector<1x256xi32>
    %c48_i32 = arith.constant 48 : i32
    %45 = vector.broadcast %c48_i32 : i32 to vector<1x256xi32>
    %46 = arith.cmpi sge, %42, %45 : vector<1x256xi32>
    %47 = arith.extui %46 : vector<1x256xi1> to vector<1x256xi32>
    %48 = arith.sitofp %47 : vector<1x256xi32> to vector<1x256xf32>
    %c3_i32 = arith.constant 3 : i32
    %49 = vector.broadcast %c3_i32 : i32 to vector<1x256xi32>
    %50 = arith.cmpi sge, %44, %49 : vector<1x256xi32>
    %51 = arith.extui %50 : vector<1x256xi1> to vector<1x256xi32>
    %52 = arith.sitofp %51 : vector<1x256xi32> to vector<1x256xf32>
    %c32_i32 = arith.constant 32 : i32
    %53 = vector.broadcast %c32_i32 : i32 to vector<1x256xi32>
    %54 = arith.cmpi sge, %42, %53 : vector<1x256xi32>
    %55 = arith.extui %54 : vector<1x256xi1> to vector<1x256xi32>
    %56 = arith.sitofp %55 : vector<1x256xi32> to vector<1x256xf32>
    %c2_i32_17 = arith.constant 2 : i32
    %57 = vector.broadcast %c2_i32_17 : i32 to vector<1x256xi32>
    %58 = arith.cmpi sge, %44, %57 : vector<1x256xi32>
    %59 = arith.extui %58 : vector<1x256xi1> to vector<1x256xi32>
    %60 = arith.sitofp %59 : vector<1x256xi32> to vector<1x256xf32>
    %c16_i32 = arith.constant 16 : i32
    %61 = vector.broadcast %c16_i32 : i32 to vector<1x256xi32>
    %62 = arith.cmpi sge, %42, %61 : vector<1x256xi32>
    %63 = arith.extui %62 : vector<1x256xi1> to vector<1x256xi32>
    %64 = arith.sitofp %63 : vector<1x256xi32> to vector<1x256xf32>
    %c1_i32 = arith.constant 1 : i32
    %65 = vector.broadcast %c1_i32 : i32 to vector<1x256xi32>
    %66 = arith.cmpi sge, %44, %65 : vector<1x256xi32>
    %67 = arith.extui %66 : vector<1x256xi1> to vector<1x256xi32>
    %68 = arith.sitofp %67 : vector<1x256xi32> to vector<1x256xf32>
    %c240_i32 = arith.constant 240 : i32
    %69 = vector.broadcast %c240_i32 : i32 to vector<1x256xi32>
    %70 = arith.cmpi slt, %42, %69 : vector<1x256xi32>
    %71 = arith.extui %70 : vector<1x256xi1> to vector<1x256xi32>
    %72 = arith.sitofp %71 : vector<1x256xi32> to vector<1x256xf32>
    %c15_i32_18 = arith.constant 15 : i32
    %73 = vector.broadcast %c15_i32_18 : i32 to vector<1x256xi32>
    %74 = arith.cmpi slt, %44, %73 : vector<1x256xi32>
    %75 = arith.extui %74 : vector<1x256xi1> to vector<1x256xi32>
    %76 = arith.sitofp %75 : vector<1x256xi32> to vector<1x256xf32>
    %c224_i32 = arith.constant 224 : i32
    %77 = vector.broadcast %c224_i32 : i32 to vector<1x256xi32>
    %78 = arith.cmpi slt, %42, %77 : vector<1x256xi32>
    %79 = arith.extui %78 : vector<1x256xi1> to vector<1x256xi32>
    %80 = arith.sitofp %79 : vector<1x256xi32> to vector<1x256xf32>
    %c14_i32 = arith.constant 14 : i32
    %81 = vector.broadcast %c14_i32 : i32 to vector<1x256xi32>
    %82 = arith.cmpi slt, %44, %81 : vector<1x256xi32>
    %83 = arith.extui %82 : vector<1x256xi1> to vector<1x256xi32>
    %84 = arith.sitofp %83 : vector<1x256xi32> to vector<1x256xf32>
    %c208_i32 = arith.constant 208 : i32
    %85 = vector.broadcast %c208_i32 : i32 to vector<1x256xi32>
    %86 = arith.cmpi slt, %42, %85 : vector<1x256xi32>
    %87 = arith.extui %86 : vector<1x256xi1> to vector<1x256xi32>
    %88 = arith.sitofp %87 : vector<1x256xi32> to vector<1x256xf32>
    %c13_i32 = arith.constant 13 : i32
    %89 = vector.broadcast %c13_i32 : i32 to vector<1x256xi32>
    %90 = arith.cmpi slt, %44, %89 : vector<1x256xi32>
    %91 = arith.extui %90 : vector<1x256xi1> to vector<1x256xi32>
    %92 = arith.sitofp %91 : vector<1x256xi32> to vector<1x256xf32>
    %cst_19 = arith.constant 0.000000e+00 : f32
    %93 = vector.broadcast %cst_19 : f32 to vector<4x256xf32>
    %c48_i32_20 = arith.constant 48 : i32
    %94 = tpu.dynamic_rotate %38 by %c48_i32_20 dim 1 : vector<4x256xf32>, i32 -> vector<4x256xf32>
    %95 = vector.broadcast %48 : vector<1x256xf32> to vector<4x256xf32>
    %96 = arith.mulf %94, %95 : vector<4x256xf32>
    %c3_i32_21 = arith.constant 3 : i32
    %97 = tpu.dynamic_rotate %96 by %c3_i32_21 dim 1 : vector<4x256xf32>, i32 -> vector<4x256xf32>
    %c0_22 = arith.constant 0 : index
    %98 = memref.load %arg4[%c0_22] : memref<98xf32, #tpu.memory_space<smem>>
    %c49 = arith.constant 49 : index
    %99 = memref.load %arg4[%c49] : memref<98xf32, #tpu.memory_space<smem>>
    %100 = vector.broadcast %98 : f32 to vector<4x1xf32>
    %101 = vector.broadcast %99 : f32 to vector<4x1xf32>
    %102 = arith.select %41, %100, %101 : vector<4x1xi1>, vector<4x1xf32>
    %103 = vector.broadcast %102 : vector<4x1xf32> to vector<4x256xf32>
    %104 = arith.mulf %97, %103 : vector<4x256xf32>
    %105 = vector.broadcast %52 : vector<1x256xf32> to vector<4x256xf32>
    %106 = arith.mulf %104, %105 : vector<4x256xf32>
    %107 = arith.addf %93, %106 : vector<4x256xf32>
    %c2_i32_23 = arith.constant 2 : i32
    %108 = tpu.dynamic_rotate %96 by %c2_i32_23 dim 1 : vector<4x256xf32>, i32 -> vector<4x256xf32>
    %c1 = arith.constant 1 : index
    %109 = memref.load %arg4[%c1] : memref<98xf32, #tpu.memory_space<smem>>
    %c50 = arith.constant 50 : index
    %110 = memref.load %arg4[%c50] : memref<98xf32, #tpu.memory_space<smem>>
    %111 = vector.broadcast %109 : f32 to vector<4x1xf32>
    %112 = vector.broadcast %110 : f32 to vector<4x1xf32>
    %113 = arith.select %41, %111, %112 : vector<4x1xi1>, vector<4x1xf32>
    %114 = vector.broadcast %113 : vector<4x1xf32> to vector<4x256xf32>
    %115 = arith.mulf %108, %114 : vector<4x256xf32>
    %116 = vector.broadcast %60 : vector<1x256xf32> to vector<4x256xf32>
    %117 = arith.mulf %115, %116 : vector<4x256xf32>
    %118 = arith.addf %107, %117 : vector<4x256xf32>
    %c1_i32_24 = arith.constant 1 : i32
    %119 = tpu.dynamic_rotate %96 by %c1_i32_24 dim 1 : vector<4x256xf32>, i32 -> vector<4x256xf32>
    %c2 = arith.constant 2 : index
    %120 = memref.load %arg4[%c2] : memref<98xf32, #tpu.memory_space<smem>>
    %c51 = arith.constant 51 : index
    %121 = memref.load %arg4[%c51] : memref<98xf32, #tpu.memory_space<smem>>
    %122 = vector.broadcast %120 : f32 to vector<4x1xf32>
    %123 = vector.broadcast %121 : f32 to vector<4x1xf32>
    %124 = arith.select %41, %122, %123 : vector<4x1xi1>, vector<4x1xf32>
    %125 = vector.broadcast %124 : vector<4x1xf32> to vector<4x256xf32>
    %126 = arith.mulf %119, %125 : vector<4x256xf32>
    %127 = vector.broadcast %68 : vector<1x256xf32> to vector<4x256xf32>
    %128 = arith.mulf %126, %127 : vector<4x256xf32>
    %129 = arith.addf %118, %128 : vector<4x256xf32>
    %c3 = arith.constant 3 : index
    %130 = memref.load %arg4[%c3] : memref<98xf32, #tpu.memory_space<smem>>
    %c52 = arith.constant 52 : index
    %131 = memref.load %arg4[%c52] : memref<98xf32, #tpu.memory_space<smem>>
    %132 = vector.broadcast %130 : f32 to vector<4x1xf32>
    %133 = vector.broadcast %131 : f32 to vector<4x1xf32>
    %134 = arith.select %41, %132, %133 : vector<4x1xi1>, vector<4x1xf32>
    %135 = vector.broadcast %134 : vector<4x1xf32> to vector<4x256xf32>
    %136 = arith.mulf %96, %135 : vector<4x256xf32>
    %137 = arith.addf %129, %136 : vector<4x256xf32>
    %c255_i32 = arith.constant 255 : i32
    %138 = tpu.dynamic_rotate %96 by %c255_i32 dim 1 : vector<4x256xf32>, i32 -> vector<4x256xf32>
    %c4 = arith.constant 4 : index
    %139 = memref.load %arg4[%c4] : memref<98xf32, #tpu.memory_space<smem>>
    %c53 = arith.constant 53 : index
    %140 = memref.load %arg4[%c53] : memref<98xf32, #tpu.memory_space<smem>>
    %141 = vector.broadcast %139 : f32 to vector<4x1xf32>
    %142 = vector.broadcast %140 : f32 to vector<4x1xf32>
    %143 = arith.select %41, %141, %142 : vector<4x1xi1>, vector<4x1xf32>
    %144 = vector.broadcast %143 : vector<4x1xf32> to vector<4x256xf32>
    %145 = arith.mulf %138, %144 : vector<4x256xf32>
    %146 = vector.broadcast %76 : vector<1x256xf32> to vector<4x256xf32>
    %147 = arith.mulf %145, %146 : vector<4x256xf32>
    %148 = arith.addf %137, %147 : vector<4x256xf32>
    %c254_i32 = arith.constant 254 : i32
    %149 = tpu.dynamic_rotate %96 by %c254_i32 dim 1 : vector<4x256xf32>, i32 -> vector<4x256xf32>
    %c5 = arith.constant 5 : index
    %150 = memref.load %arg4[%c5] : memref<98xf32, #tpu.memory_space<smem>>
    %c54 = arith.constant 54 : index
    %151 = memref.load %arg4[%c54] : memref<98xf32, #tpu.memory_space<smem>>
    %152 = vector.broadcast %150 : f32 to vector<4x1xf32>
    %153 = vector.broadcast %151 : f32 to vector<4x1xf32>
    %154 = arith.select %41, %152, %153 : vector<4x1xi1>, vector<4x1xf32>
    %155 = vector.broadcast %154 : vector<4x1xf32> to vector<4x256xf32>
    %156 = arith.mulf %149, %155 : vector<4x256xf32>
    %157 = vector.broadcast %84 : vector<1x256xf32> to vector<4x256xf32>
    %158 = arith.mulf %156, %157 : vector<4x256xf32>
    %159 = arith.addf %148, %158 : vector<4x256xf32>
    %c253_i32 = arith.constant 253 : i32
    %160 = tpu.dynamic_rotate %96 by %c253_i32 dim 1 : vector<4x256xf32>, i32 -> vector<4x256xf32>
    %c6 = arith.constant 6 : index
    %161 = memref.load %arg4[%c6] : memref<98xf32, #tpu.memory_space<smem>>
    %c55 = arith.constant 55 : index
    %162 = memref.load %arg4[%c55] : memref<98xf32, #tpu.memory_space<smem>>
    %163 = vector.broadcast %161 : f32 to vector<4x1xf32>
    %164 = vector.broadcast %162 : f32 to vector<4x1xf32>
    %165 = arith.select %41, %163, %164 : vector<4x1xi1>, vector<4x1xf32>
    %166 = vector.broadcast %165 : vector<4x1xf32> to vector<4x256xf32>
    %167 = arith.mulf %160, %166 : vector<4x256xf32>
    %168 = vector.broadcast %92 : vector<1x256xf32> to vector<4x256xf32>
    %169 = arith.mulf %167, %168 : vector<4x256xf32>
    %170 = arith.addf %159, %169 : vector<4x256xf32>
    %c32_i32_25 = arith.constant 32 : i32
    %171 = tpu.dynamic_rotate %38 by %c32_i32_25 dim 1 : vector<4x256xf32>, i32 -> vector<4x256xf32>
    %172 = vector.broadcast %56 : vector<1x256xf32> to vector<4x256xf32>
    %173 = arith.mulf %171, %172 : vector<4x256xf32>
    %c3_i32_26 = arith.constant 3 : i32
    %174 = tpu.dynamic_rotate %173 by %c3_i32_26 dim 1 : vector<4x256xf32>, i32 -> vector<4x256xf32>
    %c7 = arith.constant 7 : index
    %175 = memref.load %arg4[%c7] : memref<98xf32, #tpu.memory_space<smem>>
    %c56 = arith.constant 56 : index
    %176 = memref.load %arg4[%c56] : memref<98xf32, #tpu.memory_space<smem>>
    %177 = vector.broadcast %175 : f32 to vector<4x1xf32>
    %178 = vector.broadcast %176 : f32 to vector<4x1xf32>
    %179 = arith.select %41, %177, %178 : vector<4x1xi1>, vector<4x1xf32>
    %180 = vector.broadcast %179 : vector<4x1xf32> to vector<4x256xf32>
    %181 = arith.mulf %174, %180 : vector<4x256xf32>
    %182 = vector.broadcast %52 : vector<1x256xf32> to vector<4x256xf32>
    %183 = arith.mulf %181, %182 : vector<4x256xf32>
    %184 = arith.addf %170, %183 : vector<4x256xf32>
    %c2_i32_27 = arith.constant 2 : i32
    %185 = tpu.dynamic_rotate %173 by %c2_i32_27 dim 1 : vector<4x256xf32>, i32 -> vector<4x256xf32>
    %c8 = arith.constant 8 : index
    %186 = memref.load %arg4[%c8] : memref<98xf32, #tpu.memory_space<smem>>
    %c57 = arith.constant 57 : index
    %187 = memref.load %arg4[%c57] : memref<98xf32, #tpu.memory_space<smem>>
    %188 = vector.broadcast %186 : f32 to vector<4x1xf32>
    %189 = vector.broadcast %187 : f32 to vector<4x1xf32>
    %190 = arith.select %41, %188, %189 : vector<4x1xi1>, vector<4x1xf32>
    %191 = vector.broadcast %190 : vector<4x1xf32> to vector<4x256xf32>
    %192 = arith.mulf %185, %191 : vector<4x256xf32>
    %193 = vector.broadcast %60 : vector<1x256xf32> to vector<4x256xf32>
    %194 = arith.mulf %192, %193 : vector<4x256xf32>
    %195 = arith.addf %184, %194 : vector<4x256xf32>
    %c1_i32_28 = arith.constant 1 : i32
    %196 = tpu.dynamic_rotate %173 by %c1_i32_28 dim 1 : vector<4x256xf32>, i32 -> vector<4x256xf32>
    %c9 = arith.constant 9 : index
    %197 = memref.load %arg4[%c9] : memref<98xf32, #tpu.memory_space<smem>>
    %c58 = arith.constant 58 : index
    %198 = memref.load %arg4[%c58] : memref<98xf32, #tpu.memory_space<smem>>
    %199 = vector.broadcast %197 : f32 to vector<4x1xf32>
    %200 = vector.broadcast %198 : f32 to vector<4x1xf32>
    %201 = arith.select %41, %199, %200 : vector<4x1xi1>, vector<4x1xf32>
    %202 = vector.broadcast %201 : vector<4x1xf32> to vector<4x256xf32>
    %203 = arith.mulf %196, %202 : vector<4x256xf32>
    %204 = vector.broadcast %68 : vector<1x256xf32> to vector<4x256xf32>
    %205 = arith.mulf %203, %204 : vector<4x256xf32>
    %206 = arith.addf %195, %205 : vector<4x256xf32>
    %c10 = arith.constant 10 : index
    %207 = memref.load %arg4[%c10] : memref<98xf32, #tpu.memory_space<smem>>
    %c59 = arith.constant 59 : index
    %208 = memref.load %arg4[%c59] : memref<98xf32, #tpu.memory_space<smem>>
    %209 = vector.broadcast %207 : f32 to vector<4x1xf32>
    %210 = vector.broadcast %208 : f32 to vector<4x1xf32>
    %211 = arith.select %41, %209, %210 : vector<4x1xi1>, vector<4x1xf32>
    %212 = vector.broadcast %211 : vector<4x1xf32> to vector<4x256xf32>
    %213 = arith.mulf %173, %212 : vector<4x256xf32>
    %214 = arith.addf %206, %213 : vector<4x256xf32>
    %c255_i32_29 = arith.constant 255 : i32
    %215 = tpu.dynamic_rotate %173 by %c255_i32_29 dim 1 : vector<4x256xf32>, i32 -> vector<4x256xf32>
    %c11 = arith.constant 11 : index
    %216 = memref.load %arg4[%c11] : memref<98xf32, #tpu.memory_space<smem>>
    %c60 = arith.constant 60 : index
    %217 = memref.load %arg4[%c60] : memref<98xf32, #tpu.memory_space<smem>>
    %218 = vector.broadcast %216 : f32 to vector<4x1xf32>
    %219 = vector.broadcast %217 : f32 to vector<4x1xf32>
    %220 = arith.select %41, %218, %219 : vector<4x1xi1>, vector<4x1xf32>
    %221 = vector.broadcast %220 : vector<4x1xf32> to vector<4x256xf32>
    %222 = arith.mulf %215, %221 : vector<4x256xf32>
    %223 = vector.broadcast %76 : vector<1x256xf32> to vector<4x256xf32>
    %224 = arith.mulf %222, %223 : vector<4x256xf32>
    %225 = arith.addf %214, %224 : vector<4x256xf32>
    %c254_i32_30 = arith.constant 254 : i32
    %226 = tpu.dynamic_rotate %173 by %c254_i32_30 dim 1 : vector<4x256xf32>, i32 -> vector<4x256xf32>
    %c12 = arith.constant 12 : index
    %227 = memref.load %arg4[%c12] : memref<98xf32, #tpu.memory_space<smem>>
    %c61 = arith.constant 61 : index
    %228 = memref.load %arg4[%c61] : memref<98xf32, #tpu.memory_space<smem>>
    %229 = vector.broadcast %227 : f32 to vector<4x1xf32>
    %230 = vector.broadcast %228 : f32 to vector<4x1xf32>
    %231 = arith.select %41, %229, %230 : vector<4x1xi1>, vector<4x1xf32>
    %232 = vector.broadcast %231 : vector<4x1xf32> to vector<4x256xf32>
    %233 = arith.mulf %226, %232 : vector<4x256xf32>
    %234 = vector.broadcast %84 : vector<1x256xf32> to vector<4x256xf32>
    %235 = arith.mulf %233, %234 : vector<4x256xf32>
    %236 = arith.addf %225, %235 : vector<4x256xf32>
    %c253_i32_31 = arith.constant 253 : i32
    %237 = tpu.dynamic_rotate %173 by %c253_i32_31 dim 1 : vector<4x256xf32>, i32 -> vector<4x256xf32>
    %c13 = arith.constant 13 : index
    %238 = memref.load %arg4[%c13] : memref<98xf32, #tpu.memory_space<smem>>
    %c62 = arith.constant 62 : index
    %239 = memref.load %arg4[%c62] : memref<98xf32, #tpu.memory_space<smem>>
    %240 = vector.broadcast %238 : f32 to vector<4x1xf32>
    %241 = vector.broadcast %239 : f32 to vector<4x1xf32>
    %242 = arith.select %41, %240, %241 : vector<4x1xi1>, vector<4x1xf32>
    %243 = vector.broadcast %242 : vector<4x1xf32> to vector<4x256xf32>
    %244 = arith.mulf %237, %243 : vector<4x256xf32>
    %245 = vector.broadcast %92 : vector<1x256xf32> to vector<4x256xf32>
    %246 = arith.mulf %244, %245 : vector<4x256xf32>
    %247 = arith.addf %236, %246 : vector<4x256xf32>
    %c16_i32_32 = arith.constant 16 : i32
    %248 = tpu.dynamic_rotate %38 by %c16_i32_32 dim 1 : vector<4x256xf32>, i32 -> vector<4x256xf32>
    %249 = vector.broadcast %64 : vector<1x256xf32> to vector<4x256xf32>
    %250 = arith.mulf %248, %249 : vector<4x256xf32>
    %c3_i32_33 = arith.constant 3 : i32
    %251 = tpu.dynamic_rotate %250 by %c3_i32_33 dim 1 : vector<4x256xf32>, i32 -> vector<4x256xf32>
    %c14 = arith.constant 14 : index
    %252 = memref.load %arg4[%c14] : memref<98xf32, #tpu.memory_space<smem>>
    %c63 = arith.constant 63 : index
    %253 = memref.load %arg4[%c63] : memref<98xf32, #tpu.memory_space<smem>>
    %254 = vector.broadcast %252 : f32 to vector<4x1xf32>
    %255 = vector.broadcast %253 : f32 to vector<4x1xf32>
    %256 = arith.select %41, %254, %255 : vector<4x1xi1>, vector<4x1xf32>
    %257 = vector.broadcast %256 : vector<4x1xf32> to vector<4x256xf32>
    %258 = arith.mulf %251, %257 : vector<4x256xf32>
    %259 = vector.broadcast %52 : vector<1x256xf32> to vector<4x256xf32>
    %260 = arith.mulf %258, %259 : vector<4x256xf32>
    %261 = arith.addf %247, %260 : vector<4x256xf32>
    %c2_i32_34 = arith.constant 2 : i32
    %262 = tpu.dynamic_rotate %250 by %c2_i32_34 dim 1 : vector<4x256xf32>, i32 -> vector<4x256xf32>
    %c15 = arith.constant 15 : index
    %263 = memref.load %arg4[%c15] : memref<98xf32, #tpu.memory_space<smem>>
    %c64 = arith.constant 64 : index
    %264 = memref.load %arg4[%c64] : memref<98xf32, #tpu.memory_space<smem>>
    %265 = vector.broadcast %263 : f32 to vector<4x1xf32>
    %266 = vector.broadcast %264 : f32 to vector<4x1xf32>
    %267 = arith.select %41, %265, %266 : vector<4x1xi1>, vector<4x1xf32>
    %268 = vector.broadcast %267 : vector<4x1xf32> to vector<4x256xf32>
    %269 = arith.mulf %262, %268 : vector<4x256xf32>
    %270 = vector.broadcast %60 : vector<1x256xf32> to vector<4x256xf32>
    %271 = arith.mulf %269, %270 : vector<4x256xf32>
    %272 = arith.addf %261, %271 : vector<4x256xf32>
    %c1_i32_35 = arith.constant 1 : i32
    %273 = tpu.dynamic_rotate %250 by %c1_i32_35 dim 1 : vector<4x256xf32>, i32 -> vector<4x256xf32>
    %c16 = arith.constant 16 : index
    %274 = memref.load %arg4[%c16] : memref<98xf32, #tpu.memory_space<smem>>
    %c65 = arith.constant 65 : index
    %275 = memref.load %arg4[%c65] : memref<98xf32, #tpu.memory_space<smem>>
    %276 = vector.broadcast %274 : f32 to vector<4x1xf32>
    %277 = vector.broadcast %275 : f32 to vector<4x1xf32>
    %278 = arith.select %41, %276, %277 : vector<4x1xi1>, vector<4x1xf32>
    %279 = vector.broadcast %278 : vector<4x1xf32> to vector<4x256xf32>
    %280 = arith.mulf %273, %279 : vector<4x256xf32>
    %281 = vector.broadcast %68 : vector<1x256xf32> to vector<4x256xf32>
    %282 = arith.mulf %280, %281 : vector<4x256xf32>
    %283 = arith.addf %272, %282 : vector<4x256xf32>
    %c17 = arith.constant 17 : index
    %284 = memref.load %arg4[%c17] : memref<98xf32, #tpu.memory_space<smem>>
    %c66 = arith.constant 66 : index
    %285 = memref.load %arg4[%c66] : memref<98xf32, #tpu.memory_space<smem>>
    %286 = vector.broadcast %284 : f32 to vector<4x1xf32>
    %287 = vector.broadcast %285 : f32 to vector<4x1xf32>
    %288 = arith.select %41, %286, %287 : vector<4x1xi1>, vector<4x1xf32>
    %289 = vector.broadcast %288 : vector<4x1xf32> to vector<4x256xf32>
    %290 = arith.mulf %250, %289 : vector<4x256xf32>
    %291 = arith.addf %283, %290 : vector<4x256xf32>
    %c255_i32_36 = arith.constant 255 : i32
    %292 = tpu.dynamic_rotate %250 by %c255_i32_36 dim 1 : vector<4x256xf32>, i32 -> vector<4x256xf32>
    %c18 = arith.constant 18 : index
    %293 = memref.load %arg4[%c18] : memref<98xf32, #tpu.memory_space<smem>>
    %c67 = arith.constant 67 : index
    %294 = memref.load %arg4[%c67] : memref<98xf32, #tpu.memory_space<smem>>
    %295 = vector.broadcast %293 : f32 to vector<4x1xf32>
    %296 = vector.broadcast %294 : f32 to vector<4x1xf32>
    %297 = arith.select %41, %295, %296 : vector<4x1xi1>, vector<4x1xf32>
    %298 = vector.broadcast %297 : vector<4x1xf32> to vector<4x256xf32>
    %299 = arith.mulf %292, %298 : vector<4x256xf32>
    %300 = vector.broadcast %76 : vector<1x256xf32> to vector<4x256xf32>
    %301 = arith.mulf %299, %300 : vector<4x256xf32>
    %302 = arith.addf %291, %301 : vector<4x256xf32>
    %c254_i32_37 = arith.constant 254 : i32
    %303 = tpu.dynamic_rotate %250 by %c254_i32_37 dim 1 : vector<4x256xf32>, i32 -> vector<4x256xf32>
    %c19 = arith.constant 19 : index
    %304 = memref.load %arg4[%c19] : memref<98xf32, #tpu.memory_space<smem>>
    %c68 = arith.constant 68 : index
    %305 = memref.load %arg4[%c68] : memref<98xf32, #tpu.memory_space<smem>>
    %306 = vector.broadcast %304 : f32 to vector<4x1xf32>
    %307 = vector.broadcast %305 : f32 to vector<4x1xf32>
    %308 = arith.select %41, %306, %307 : vector<4x1xi1>, vector<4x1xf32>
    %309 = vector.broadcast %308 : vector<4x1xf32> to vector<4x256xf32>
    %310 = arith.mulf %303, %309 : vector<4x256xf32>
    %311 = vector.broadcast %84 : vector<1x256xf32> to vector<4x256xf32>
    %312 = arith.mulf %310, %311 : vector<4x256xf32>
    %313 = arith.addf %302, %312 : vector<4x256xf32>
    %c253_i32_38 = arith.constant 253 : i32
    %314 = tpu.dynamic_rotate %250 by %c253_i32_38 dim 1 : vector<4x256xf32>, i32 -> vector<4x256xf32>
    %c20 = arith.constant 20 : index
    %315 = memref.load %arg4[%c20] : memref<98xf32, #tpu.memory_space<smem>>
    %c69 = arith.constant 69 : index
    %316 = memref.load %arg4[%c69] : memref<98xf32, #tpu.memory_space<smem>>
    %317 = vector.broadcast %315 : f32 to vector<4x1xf32>
    %318 = vector.broadcast %316 : f32 to vector<4x1xf32>
    %319 = arith.select %41, %317, %318 : vector<4x1xi1>, vector<4x1xf32>
    %320 = vector.broadcast %319 : vector<4x1xf32> to vector<4x256xf32>
    %321 = arith.mulf %314, %320 : vector<4x256xf32>
    %322 = vector.broadcast %92 : vector<1x256xf32> to vector<4x256xf32>
    %323 = arith.mulf %321, %322 : vector<4x256xf32>
    %324 = arith.addf %313, %323 : vector<4x256xf32>
    %c3_i32_39 = arith.constant 3 : i32
    %325 = tpu.dynamic_rotate %38 by %c3_i32_39 dim 1 : vector<4x256xf32>, i32 -> vector<4x256xf32>
    %c21 = arith.constant 21 : index
    %326 = memref.load %arg4[%c21] : memref<98xf32, #tpu.memory_space<smem>>
    %c70 = arith.constant 70 : index
    %327 = memref.load %arg4[%c70] : memref<98xf32, #tpu.memory_space<smem>>
    %328 = vector.broadcast %326 : f32 to vector<4x1xf32>
    %329 = vector.broadcast %327 : f32 to vector<4x1xf32>
    %330 = arith.select %41, %328, %329 : vector<4x1xi1>, vector<4x1xf32>
    %331 = vector.broadcast %330 : vector<4x1xf32> to vector<4x256xf32>
    %332 = arith.mulf %325, %331 : vector<4x256xf32>
    %333 = vector.broadcast %52 : vector<1x256xf32> to vector<4x256xf32>
    %334 = arith.mulf %332, %333 : vector<4x256xf32>
    %335 = arith.addf %324, %334 : vector<4x256xf32>
    %c2_i32_40 = arith.constant 2 : i32
    %336 = tpu.dynamic_rotate %38 by %c2_i32_40 dim 1 : vector<4x256xf32>, i32 -> vector<4x256xf32>
    %c22 = arith.constant 22 : index
    %337 = memref.load %arg4[%c22] : memref<98xf32, #tpu.memory_space<smem>>
    %c71 = arith.constant 71 : index
    %338 = memref.load %arg4[%c71] : memref<98xf32, #tpu.memory_space<smem>>
    %339 = vector.broadcast %337 : f32 to vector<4x1xf32>
    %340 = vector.broadcast %338 : f32 to vector<4x1xf32>
    %341 = arith.select %41, %339, %340 : vector<4x1xi1>, vector<4x1xf32>
    %342 = vector.broadcast %341 : vector<4x1xf32> to vector<4x256xf32>
    %343 = arith.mulf %336, %342 : vector<4x256xf32>
    %344 = vector.broadcast %60 : vector<1x256xf32> to vector<4x256xf32>
    %345 = arith.mulf %343, %344 : vector<4x256xf32>
    %346 = arith.addf %335, %345 : vector<4x256xf32>
    %c1_i32_41 = arith.constant 1 : i32
    %347 = tpu.dynamic_rotate %38 by %c1_i32_41 dim 1 : vector<4x256xf32>, i32 -> vector<4x256xf32>
    %c23 = arith.constant 23 : index
    %348 = memref.load %arg4[%c23] : memref<98xf32, #tpu.memory_space<smem>>
    %c72 = arith.constant 72 : index
    %349 = memref.load %arg4[%c72] : memref<98xf32, #tpu.memory_space<smem>>
    %350 = vector.broadcast %348 : f32 to vector<4x1xf32>
    %351 = vector.broadcast %349 : f32 to vector<4x1xf32>
    %352 = arith.select %41, %350, %351 : vector<4x1xi1>, vector<4x1xf32>
    %353 = vector.broadcast %352 : vector<4x1xf32> to vector<4x256xf32>
    %354 = arith.mulf %347, %353 : vector<4x256xf32>
    %355 = vector.broadcast %68 : vector<1x256xf32> to vector<4x256xf32>
    %356 = arith.mulf %354, %355 : vector<4x256xf32>
    %357 = arith.addf %346, %356 : vector<4x256xf32>
    %c24 = arith.constant 24 : index
    %358 = memref.load %arg4[%c24] : memref<98xf32, #tpu.memory_space<smem>>
    %c73 = arith.constant 73 : index
    %359 = memref.load %arg4[%c73] : memref<98xf32, #tpu.memory_space<smem>>
    %360 = vector.broadcast %358 : f32 to vector<4x1xf32>
    %361 = vector.broadcast %359 : f32 to vector<4x1xf32>
    %362 = arith.select %41, %360, %361 : vector<4x1xi1>, vector<4x1xf32>
    %363 = vector.broadcast %362 : vector<4x1xf32> to vector<4x256xf32>
    %364 = arith.mulf %38, %363 : vector<4x256xf32>
    %365 = arith.addf %357, %364 : vector<4x256xf32>
    %c255_i32_42 = arith.constant 255 : i32
    %366 = tpu.dynamic_rotate %38 by %c255_i32_42 dim 1 : vector<4x256xf32>, i32 -> vector<4x256xf32>
    %c25 = arith.constant 25 : index
    %367 = memref.load %arg4[%c25] : memref<98xf32, #tpu.memory_space<smem>>
    %c74 = arith.constant 74 : index
    %368 = memref.load %arg4[%c74] : memref<98xf32, #tpu.memory_space<smem>>
    %369 = vector.broadcast %367 : f32 to vector<4x1xf32>
    %370 = vector.broadcast %368 : f32 to vector<4x1xf32>
    %371 = arith.select %41, %369, %370 : vector<4x1xi1>, vector<4x1xf32>
    %372 = vector.broadcast %371 : vector<4x1xf32> to vector<4x256xf32>
    %373 = arith.mulf %366, %372 : vector<4x256xf32>
    %374 = vector.broadcast %76 : vector<1x256xf32> to vector<4x256xf32>
    %375 = arith.mulf %373, %374 : vector<4x256xf32>
    %376 = arith.addf %365, %375 : vector<4x256xf32>
    %c254_i32_43 = arith.constant 254 : i32
    %377 = tpu.dynamic_rotate %38 by %c254_i32_43 dim 1 : vector<4x256xf32>, i32 -> vector<4x256xf32>
    %c26 = arith.constant 26 : index
    %378 = memref.load %arg4[%c26] : memref<98xf32, #tpu.memory_space<smem>>
    %c75 = arith.constant 75 : index
    %379 = memref.load %arg4[%c75] : memref<98xf32, #tpu.memory_space<smem>>
    %380 = vector.broadcast %378 : f32 to vector<4x1xf32>
    %381 = vector.broadcast %379 : f32 to vector<4x1xf32>
    %382 = arith.select %41, %380, %381 : vector<4x1xi1>, vector<4x1xf32>
    %383 = vector.broadcast %382 : vector<4x1xf32> to vector<4x256xf32>
    %384 = arith.mulf %377, %383 : vector<4x256xf32>
    %385 = vector.broadcast %84 : vector<1x256xf32> to vector<4x256xf32>
    %386 = arith.mulf %384, %385 : vector<4x256xf32>
    %387 = arith.addf %376, %386 : vector<4x256xf32>
    %c253_i32_44 = arith.constant 253 : i32
    %388 = tpu.dynamic_rotate %38 by %c253_i32_44 dim 1 : vector<4x256xf32>, i32 -> vector<4x256xf32>
    %c27 = arith.constant 27 : index
    %389 = memref.load %arg4[%c27] : memref<98xf32, #tpu.memory_space<smem>>
    %c76 = arith.constant 76 : index
    %390 = memref.load %arg4[%c76] : memref<98xf32, #tpu.memory_space<smem>>
    %391 = vector.broadcast %389 : f32 to vector<4x1xf32>
    %392 = vector.broadcast %390 : f32 to vector<4x1xf32>
    %393 = arith.select %41, %391, %392 : vector<4x1xi1>, vector<4x1xf32>
    %394 = vector.broadcast %393 : vector<4x1xf32> to vector<4x256xf32>
    %395 = arith.mulf %388, %394 : vector<4x256xf32>
    %396 = vector.broadcast %92 : vector<1x256xf32> to vector<4x256xf32>
    %397 = arith.mulf %395, %396 : vector<4x256xf32>
    %398 = arith.addf %387, %397 : vector<4x256xf32>
    %c240_i32_45 = arith.constant 240 : i32
    %399 = tpu.dynamic_rotate %38 by %c240_i32_45 dim 1 : vector<4x256xf32>, i32 -> vector<4x256xf32>
    %400 = vector.broadcast %72 : vector<1x256xf32> to vector<4x256xf32>
    %401 = arith.mulf %399, %400 : vector<4x256xf32>
    %c3_i32_46 = arith.constant 3 : i32
    %402 = tpu.dynamic_rotate %401 by %c3_i32_46 dim 1 : vector<4x256xf32>, i32 -> vector<4x256xf32>
    %c28 = arith.constant 28 : index
    %403 = memref.load %arg4[%c28] : memref<98xf32, #tpu.memory_space<smem>>
    %c77 = arith.constant 77 : index
    %404 = memref.load %arg4[%c77] : memref<98xf32, #tpu.memory_space<smem>>
    %405 = vector.broadcast %403 : f32 to vector<4x1xf32>
    %406 = vector.broadcast %404 : f32 to vector<4x1xf32>
    %407 = arith.select %41, %405, %406 : vector<4x1xi1>, vector<4x1xf32>
    %408 = vector.broadcast %407 : vector<4x1xf32> to vector<4x256xf32>
    %409 = arith.mulf %402, %408 : vector<4x256xf32>
    %410 = vector.broadcast %52 : vector<1x256xf32> to vector<4x256xf32>
    %411 = arith.mulf %409, %410 : vector<4x256xf32>
    %412 = arith.addf %398, %411 : vector<4x256xf32>
    %c2_i32_47 = arith.constant 2 : i32
    %413 = tpu.dynamic_rotate %401 by %c2_i32_47 dim 1 : vector<4x256xf32>, i32 -> vector<4x256xf32>
    %c29 = arith.constant 29 : index
    %414 = memref.load %arg4[%c29] : memref<98xf32, #tpu.memory_space<smem>>
    %c78 = arith.constant 78 : index
    %415 = memref.load %arg4[%c78] : memref<98xf32, #tpu.memory_space<smem>>
    %416 = vector.broadcast %414 : f32 to vector<4x1xf32>
    %417 = vector.broadcast %415 : f32 to vector<4x1xf32>
    %418 = arith.select %41, %416, %417 : vector<4x1xi1>, vector<4x1xf32>
    %419 = vector.broadcast %418 : vector<4x1xf32> to vector<4x256xf32>
    %420 = arith.mulf %413, %419 : vector<4x256xf32>
    %421 = vector.broadcast %60 : vector<1x256xf32> to vector<4x256xf32>
    %422 = arith.mulf %420, %421 : vector<4x256xf32>
    %423 = arith.addf %412, %422 : vector<4x256xf32>
    %c1_i32_48 = arith.constant 1 : i32
    %424 = tpu.dynamic_rotate %401 by %c1_i32_48 dim 1 : vector<4x256xf32>, i32 -> vector<4x256xf32>
    %c30 = arith.constant 30 : index
    %425 = memref.load %arg4[%c30] : memref<98xf32, #tpu.memory_space<smem>>
    %c79 = arith.constant 79 : index
    %426 = memref.load %arg4[%c79] : memref<98xf32, #tpu.memory_space<smem>>
    %427 = vector.broadcast %425 : f32 to vector<4x1xf32>
    %428 = vector.broadcast %426 : f32 to vector<4x1xf32>
    %429 = arith.select %41, %427, %428 : vector<4x1xi1>, vector<4x1xf32>
    %430 = vector.broadcast %429 : vector<4x1xf32> to vector<4x256xf32>
    %431 = arith.mulf %424, %430 : vector<4x256xf32>
    %432 = vector.broadcast %68 : vector<1x256xf32> to vector<4x256xf32>
    %433 = arith.mulf %431, %432 : vector<4x256xf32>
    %434 = arith.addf %423, %433 : vector<4x256xf32>
    %c31 = arith.constant 31 : index
    %435 = memref.load %arg4[%c31] : memref<98xf32, #tpu.memory_space<smem>>
    %c80 = arith.constant 80 : index
    %436 = memref.load %arg4[%c80] : memref<98xf32, #tpu.memory_space<smem>>
    %437 = vector.broadcast %435 : f32 to vector<4x1xf32>
    %438 = vector.broadcast %436 : f32 to vector<4x1xf32>
    %439 = arith.select %41, %437, %438 : vector<4x1xi1>, vector<4x1xf32>
    %440 = vector.broadcast %439 : vector<4x1xf32> to vector<4x256xf32>
    %441 = arith.mulf %401, %440 : vector<4x256xf32>
    %442 = arith.addf %434, %441 : vector<4x256xf32>
    %c255_i32_49 = arith.constant 255 : i32
    %443 = tpu.dynamic_rotate %401 by %c255_i32_49 dim 1 : vector<4x256xf32>, i32 -> vector<4x256xf32>
    %c32 = arith.constant 32 : index
    %444 = memref.load %arg4[%c32] : memref<98xf32, #tpu.memory_space<smem>>
    %c81 = arith.constant 81 : index
    %445 = memref.load %arg4[%c81] : memref<98xf32, #tpu.memory_space<smem>>
    %446 = vector.broadcast %444 : f32 to vector<4x1xf32>
    %447 = vector.broadcast %445 : f32 to vector<4x1xf32>
    %448 = arith.select %41, %446, %447 : vector<4x1xi1>, vector<4x1xf32>
    %449 = vector.broadcast %448 : vector<4x1xf32> to vector<4x256xf32>
    %450 = arith.mulf %443, %449 : vector<4x256xf32>
    %451 = vector.broadcast %76 : vector<1x256xf32> to vector<4x256xf32>
    %452 = arith.mulf %450, %451 : vector<4x256xf32>
    %453 = arith.addf %442, %452 : vector<4x256xf32>
    %c254_i32_50 = arith.constant 254 : i32
    %454 = tpu.dynamic_rotate %401 by %c254_i32_50 dim 1 : vector<4x256xf32>, i32 -> vector<4x256xf32>
    %c33 = arith.constant 33 : index
    %455 = memref.load %arg4[%c33] : memref<98xf32, #tpu.memory_space<smem>>
    %c82 = arith.constant 82 : index
    %456 = memref.load %arg4[%c82] : memref<98xf32, #tpu.memory_space<smem>>
    %457 = vector.broadcast %455 : f32 to vector<4x1xf32>
    %458 = vector.broadcast %456 : f32 to vector<4x1xf32>
    %459 = arith.select %41, %457, %458 : vector<4x1xi1>, vector<4x1xf32>
    %460 = vector.broadcast %459 : vector<4x1xf32> to vector<4x256xf32>
    %461 = arith.mulf %454, %460 : vector<4x256xf32>
    %462 = vector.broadcast %84 : vector<1x256xf32> to vector<4x256xf32>
    %463 = arith.mulf %461, %462 : vector<4x256xf32>
    %464 = arith.addf %453, %463 : vector<4x256xf32>
    %c253_i32_51 = arith.constant 253 : i32
    %465 = tpu.dynamic_rotate %401 by %c253_i32_51 dim 1 : vector<4x256xf32>, i32 -> vector<4x256xf32>
    %c34 = arith.constant 34 : index
    %466 = memref.load %arg4[%c34] : memref<98xf32, #tpu.memory_space<smem>>
    %c83 = arith.constant 83 : index
    %467 = memref.load %arg4[%c83] : memref<98xf32, #tpu.memory_space<smem>>
    %468 = vector.broadcast %466 : f32 to vector<4x1xf32>
    %469 = vector.broadcast %467 : f32 to vector<4x1xf32>
    %470 = arith.select %41, %468, %469 : vector<4x1xi1>, vector<4x1xf32>
    %471 = vector.broadcast %470 : vector<4x1xf32> to vector<4x256xf32>
    %472 = arith.mulf %465, %471 : vector<4x256xf32>
    %473 = vector.broadcast %92 : vector<1x256xf32> to vector<4x256xf32>
    %474 = arith.mulf %472, %473 : vector<4x256xf32>
    %475 = arith.addf %464, %474 : vector<4x256xf32>
    %c224_i32_52 = arith.constant 224 : i32
    %476 = tpu.dynamic_rotate %38 by %c224_i32_52 dim 1 : vector<4x256xf32>, i32 -> vector<4x256xf32>
    %477 = vector.broadcast %80 : vector<1x256xf32> to vector<4x256xf32>
    %478 = arith.mulf %476, %477 : vector<4x256xf32>
    %c3_i32_53 = arith.constant 3 : i32
    %479 = tpu.dynamic_rotate %478 by %c3_i32_53 dim 1 : vector<4x256xf32>, i32 -> vector<4x256xf32>
    %c35 = arith.constant 35 : index
    %480 = memref.load %arg4[%c35] : memref<98xf32, #tpu.memory_space<smem>>
    %c84 = arith.constant 84 : index
    %481 = memref.load %arg4[%c84] : memref<98xf32, #tpu.memory_space<smem>>
    %482 = vector.broadcast %480 : f32 to vector<4x1xf32>
    %483 = vector.broadcast %481 : f32 to vector<4x1xf32>
    %484 = arith.select %41, %482, %483 : vector<4x1xi1>, vector<4x1xf32>
    %485 = vector.broadcast %484 : vector<4x1xf32> to vector<4x256xf32>
    %486 = arith.mulf %479, %485 : vector<4x256xf32>
    %487 = vector.broadcast %52 : vector<1x256xf32> to vector<4x256xf32>
    %488 = arith.mulf %486, %487 : vector<4x256xf32>
    %489 = arith.addf %475, %488 : vector<4x256xf32>
    %c2_i32_54 = arith.constant 2 : i32
    %490 = tpu.dynamic_rotate %478 by %c2_i32_54 dim 1 : vector<4x256xf32>, i32 -> vector<4x256xf32>
    %c36 = arith.constant 36 : index
    %491 = memref.load %arg4[%c36] : memref<98xf32, #tpu.memory_space<smem>>
    %c85 = arith.constant 85 : index
    %492 = memref.load %arg4[%c85] : memref<98xf32, #tpu.memory_space<smem>>
    %493 = vector.broadcast %491 : f32 to vector<4x1xf32>
    %494 = vector.broadcast %492 : f32 to vector<4x1xf32>
    %495 = arith.select %41, %493, %494 : vector<4x1xi1>, vector<4x1xf32>
    %496 = vector.broadcast %495 : vector<4x1xf32> to vector<4x256xf32>
    %497 = arith.mulf %490, %496 : vector<4x256xf32>
    %498 = vector.broadcast %60 : vector<1x256xf32> to vector<4x256xf32>
    %499 = arith.mulf %497, %498 : vector<4x256xf32>
    %500 = arith.addf %489, %499 : vector<4x256xf32>
    %c1_i32_55 = arith.constant 1 : i32
    %501 = tpu.dynamic_rotate %478 by %c1_i32_55 dim 1 : vector<4x256xf32>, i32 -> vector<4x256xf32>
    %c37 = arith.constant 37 : index
    %502 = memref.load %arg4[%c37] : memref<98xf32, #tpu.memory_space<smem>>
    %c86 = arith.constant 86 : index
    %503 = memref.load %arg4[%c86] : memref<98xf32, #tpu.memory_space<smem>>
    %504 = vector.broadcast %502 : f32 to vector<4x1xf32>
    %505 = vector.broadcast %503 : f32 to vector<4x1xf32>
    %506 = arith.select %41, %504, %505 : vector<4x1xi1>, vector<4x1xf32>
    %507 = vector.broadcast %506 : vector<4x1xf32> to vector<4x256xf32>
    %508 = arith.mulf %501, %507 : vector<4x256xf32>
    %509 = vector.broadcast %68 : vector<1x256xf32> to vector<4x256xf32>
    %510 = arith.mulf %508, %509 : vector<4x256xf32>
    %511 = arith.addf %500, %510 : vector<4x256xf32>
    %c38 = arith.constant 38 : index
    %512 = memref.load %arg4[%c38] : memref<98xf32, #tpu.memory_space<smem>>
    %c87 = arith.constant 87 : index
    %513 = memref.load %arg4[%c87] : memref<98xf32, #tpu.memory_space<smem>>
    %514 = vector.broadcast %512 : f32 to vector<4x1xf32>
    %515 = vector.broadcast %513 : f32 to vector<4x1xf32>
    %516 = arith.select %41, %514, %515 : vector<4x1xi1>, vector<4x1xf32>
    %517 = vector.broadcast %516 : vector<4x1xf32> to vector<4x256xf32>
    %518 = arith.mulf %478, %517 : vector<4x256xf32>
    %519 = arith.addf %511, %518 : vector<4x256xf32>
    %c255_i32_56 = arith.constant 255 : i32
    %520 = tpu.dynamic_rotate %478 by %c255_i32_56 dim 1 : vector<4x256xf32>, i32 -> vector<4x256xf32>
    %c39 = arith.constant 39 : index
    %521 = memref.load %arg4[%c39] : memref<98xf32, #tpu.memory_space<smem>>
    %c88 = arith.constant 88 : index
    %522 = memref.load %arg4[%c88] : memref<98xf32, #tpu.memory_space<smem>>
    %523 = vector.broadcast %521 : f32 to vector<4x1xf32>
    %524 = vector.broadcast %522 : f32 to vector<4x1xf32>
    %525 = arith.select %41, %523, %524 : vector<4x1xi1>, vector<4x1xf32>
    %526 = vector.broadcast %525 : vector<4x1xf32> to vector<4x256xf32>
    %527 = arith.mulf %520, %526 : vector<4x256xf32>
    %528 = vector.broadcast %76 : vector<1x256xf32> to vector<4x256xf32>
    %529 = arith.mulf %527, %528 : vector<4x256xf32>
    %530 = arith.addf %519, %529 : vector<4x256xf32>
    %c254_i32_57 = arith.constant 254 : i32
    %531 = tpu.dynamic_rotate %478 by %c254_i32_57 dim 1 : vector<4x256xf32>, i32 -> vector<4x256xf32>
    %c40 = arith.constant 40 : index
    %532 = memref.load %arg4[%c40] : memref<98xf32, #tpu.memory_space<smem>>
    %c89 = arith.constant 89 : index
    %533 = memref.load %arg4[%c89] : memref<98xf32, #tpu.memory_space<smem>>
    %534 = vector.broadcast %532 : f32 to vector<4x1xf32>
    %535 = vector.broadcast %533 : f32 to vector<4x1xf32>
    %536 = arith.select %41, %534, %535 : vector<4x1xi1>, vector<4x1xf32>
    %537 = vector.broadcast %536 : vector<4x1xf32> to vector<4x256xf32>
    %538 = arith.mulf %531, %537 : vector<4x256xf32>
    %539 = vector.broadcast %84 : vector<1x256xf32> to vector<4x256xf32>
    %540 = arith.mulf %538, %539 : vector<4x256xf32>
    %541 = arith.addf %530, %540 : vector<4x256xf32>
    %c253_i32_58 = arith.constant 253 : i32
    %542 = tpu.dynamic_rotate %478 by %c253_i32_58 dim 1 : vector<4x256xf32>, i32 -> vector<4x256xf32>
    %c41 = arith.constant 41 : index
    %543 = memref.load %arg4[%c41] : memref<98xf32, #tpu.memory_space<smem>>
    %c90 = arith.constant 90 : index
    %544 = memref.load %arg4[%c90] : memref<98xf32, #tpu.memory_space<smem>>
    %545 = vector.broadcast %543 : f32 to vector<4x1xf32>
    %546 = vector.broadcast %544 : f32 to vector<4x1xf32>
    %547 = arith.select %41, %545, %546 : vector<4x1xi1>, vector<4x1xf32>
    %548 = vector.broadcast %547 : vector<4x1xf32> to vector<4x256xf32>
    %549 = arith.mulf %542, %548 : vector<4x256xf32>
    %550 = vector.broadcast %92 : vector<1x256xf32> to vector<4x256xf32>
    %551 = arith.mulf %549, %550 : vector<4x256xf32>
    %552 = arith.addf %541, %551 : vector<4x256xf32>
    %c208_i32_59 = arith.constant 208 : i32
    %553 = tpu.dynamic_rotate %38 by %c208_i32_59 dim 1 : vector<4x256xf32>, i32 -> vector<4x256xf32>
    %554 = vector.broadcast %88 : vector<1x256xf32> to vector<4x256xf32>
    %555 = arith.mulf %553, %554 : vector<4x256xf32>
    %c3_i32_60 = arith.constant 3 : i32
    %556 = tpu.dynamic_rotate %555 by %c3_i32_60 dim 1 : vector<4x256xf32>, i32 -> vector<4x256xf32>
    %c42 = arith.constant 42 : index
    %557 = memref.load %arg4[%c42] : memref<98xf32, #tpu.memory_space<smem>>
    %c91 = arith.constant 91 : index
    %558 = memref.load %arg4[%c91] : memref<98xf32, #tpu.memory_space<smem>>
    %559 = vector.broadcast %557 : f32 to vector<4x1xf32>
    %560 = vector.broadcast %558 : f32 to vector<4x1xf32>
    %561 = arith.select %41, %559, %560 : vector<4x1xi1>, vector<4x1xf32>
    %562 = vector.broadcast %561 : vector<4x1xf32> to vector<4x256xf32>
    %563 = arith.mulf %556, %562 : vector<4x256xf32>
    %564 = vector.broadcast %52 : vector<1x256xf32> to vector<4x256xf32>
    %565 = arith.mulf %563, %564 : vector<4x256xf32>
    %566 = arith.addf %552, %565 : vector<4x256xf32>
    %c2_i32_61 = arith.constant 2 : i32
    %567 = tpu.dynamic_rotate %555 by %c2_i32_61 dim 1 : vector<4x256xf32>, i32 -> vector<4x256xf32>
    %c43 = arith.constant 43 : index
    %568 = memref.load %arg4[%c43] : memref<98xf32, #tpu.memory_space<smem>>
    %c92 = arith.constant 92 : index
    %569 = memref.load %arg4[%c92] : memref<98xf32, #tpu.memory_space<smem>>
    %570 = vector.broadcast %568 : f32 to vector<4x1xf32>
    %571 = vector.broadcast %569 : f32 to vector<4x1xf32>
    %572 = arith.select %41, %570, %571 : vector<4x1xi1>, vector<4x1xf32>
    %573 = vector.broadcast %572 : vector<4x1xf32> to vector<4x256xf32>
    %574 = arith.mulf %567, %573 : vector<4x256xf32>
    %575 = vector.broadcast %60 : vector<1x256xf32> to vector<4x256xf32>
    %576 = arith.mulf %574, %575 : vector<4x256xf32>
    %577 = arith.addf %566, %576 : vector<4x256xf32>
    %c1_i32_62 = arith.constant 1 : i32
    %578 = tpu.dynamic_rotate %555 by %c1_i32_62 dim 1 : vector<4x256xf32>, i32 -> vector<4x256xf32>
    %c44 = arith.constant 44 : index
    %579 = memref.load %arg4[%c44] : memref<98xf32, #tpu.memory_space<smem>>
    %c93 = arith.constant 93 : index
    %580 = memref.load %arg4[%c93] : memref<98xf32, #tpu.memory_space<smem>>
    %581 = vector.broadcast %579 : f32 to vector<4x1xf32>
    %582 = vector.broadcast %580 : f32 to vector<4x1xf32>
    %583 = arith.select %41, %581, %582 : vector<4x1xi1>, vector<4x1xf32>
    %584 = vector.broadcast %583 : vector<4x1xf32> to vector<4x256xf32>
    %585 = arith.mulf %578, %584 : vector<4x256xf32>
    %586 = vector.broadcast %68 : vector<1x256xf32> to vector<4x256xf32>
    %587 = arith.mulf %585, %586 : vector<4x256xf32>
    %588 = arith.addf %577, %587 : vector<4x256xf32>
    %c45 = arith.constant 45 : index
    %589 = memref.load %arg4[%c45] : memref<98xf32, #tpu.memory_space<smem>>
    %c94 = arith.constant 94 : index
    %590 = memref.load %arg4[%c94] : memref<98xf32, #tpu.memory_space<smem>>
    %591 = vector.broadcast %589 : f32 to vector<4x1xf32>
    %592 = vector.broadcast %590 : f32 to vector<4x1xf32>
    %593 = arith.select %41, %591, %592 : vector<4x1xi1>, vector<4x1xf32>
    %594 = vector.broadcast %593 : vector<4x1xf32> to vector<4x256xf32>
    %595 = arith.mulf %555, %594 : vector<4x256xf32>
    %596 = arith.addf %588, %595 : vector<4x256xf32>
    %c255_i32_63 = arith.constant 255 : i32
    %597 = tpu.dynamic_rotate %555 by %c255_i32_63 dim 1 : vector<4x256xf32>, i32 -> vector<4x256xf32>
    %c46 = arith.constant 46 : index
    %598 = memref.load %arg4[%c46] : memref<98xf32, #tpu.memory_space<smem>>
    %c95 = arith.constant 95 : index
    %599 = memref.load %arg4[%c95] : memref<98xf32, #tpu.memory_space<smem>>
    %600 = vector.broadcast %598 : f32 to vector<4x1xf32>
    %601 = vector.broadcast %599 : f32 to vector<4x1xf32>
    %602 = arith.select %41, %600, %601 : vector<4x1xi1>, vector<4x1xf32>
    %603 = vector.broadcast %602 : vector<4x1xf32> to vector<4x256xf32>
    %604 = arith.mulf %597, %603 : vector<4x256xf32>
    %605 = vector.broadcast %76 : vector<1x256xf32> to vector<4x256xf32>
    %606 = arith.mulf %604, %605 : vector<4x256xf32>
    %607 = arith.addf %596, %606 : vector<4x256xf32>
    %c254_i32_64 = arith.constant 254 : i32
    %608 = tpu.dynamic_rotate %555 by %c254_i32_64 dim 1 : vector<4x256xf32>, i32 -> vector<4x256xf32>
    %c47 = arith.constant 47 : index
    %609 = memref.load %arg4[%c47] : memref<98xf32, #tpu.memory_space<smem>>
    %c96 = arith.constant 96 : index
    %610 = memref.load %arg4[%c96] : memref<98xf32, #tpu.memory_space<smem>>
    %611 = vector.broadcast %609 : f32 to vector<4x1xf32>
    %612 = vector.broadcast %610 : f32 to vector<4x1xf32>
    %613 = arith.select %41, %611, %612 : vector<4x1xi1>, vector<4x1xf32>
    %614 = vector.broadcast %613 : vector<4x1xf32> to vector<4x256xf32>
    %615 = arith.mulf %608, %614 : vector<4x256xf32>
    %616 = vector.broadcast %84 : vector<1x256xf32> to vector<4x256xf32>
    %617 = arith.mulf %615, %616 : vector<4x256xf32>
    %618 = arith.addf %607, %617 : vector<4x256xf32>
    %c253_i32_65 = arith.constant 253 : i32
    %619 = tpu.dynamic_rotate %555 by %c253_i32_65 dim 1 : vector<4x256xf32>, i32 -> vector<4x256xf32>
    %c48 = arith.constant 48 : index
    %620 = memref.load %arg4[%c48] : memref<98xf32, #tpu.memory_space<smem>>
    %c97 = arith.constant 97 : index
    %621 = memref.load %arg4[%c97] : memref<98xf32, #tpu.memory_space<smem>>
    %622 = vector.broadcast %620 : f32 to vector<4x1xf32>
    %623 = vector.broadcast %621 : f32 to vector<4x1xf32>
    %624 = arith.select %41, %622, %623 : vector<4x1xi1>, vector<4x1xf32>
    %625 = vector.broadcast %624 : vector<4x1xf32> to vector<4x256xf32>
    %626 = arith.mulf %619, %625 : vector<4x256xf32>
    %627 = vector.broadcast %92 : vector<1x256xf32> to vector<4x256xf32>
    %628 = arith.mulf %626, %627 : vector<4x256xf32>
    %629 = arith.addf %618, %628 : vector<4x256xf32>
    %630 = vector.extract_strided_slice %629 {offsets = [0, 0], sizes = [2, 256], strides = [1, 1]} : vector<4x256xf32> to vector<2x256xf32>
    %631 = vector.extract_strided_slice %629 {offsets = [2, 0], sizes = [2, 256], strides = [1, 1]} : vector<4x256xf32> to vector<2x256xf32>
    %632 = arith.addf %630, %631 : vector<2x256xf32>
    %633 = arith.negf %632 : vector<2x256xf32>
    %634 = math.exp %633 : vector<2x256xf32>
    %cst_66 = arith.constant 1.000000e+00 : f32
    %635 = vector.broadcast %cst_66 : f32 to vector<2x256xf32>
    %636 = arith.addf %635, %634 : vector<2x256xf32>
    %637 = arith.divf %635, %636 : vector<2x256xf32>
    %638 = vector.extract_strided_slice %23 {offsets = [0, 0], sizes = [4, 256], strides = [1, 1]} : vector<8x256xf32> to vector<4x256xf32>
    %639 = vector.extract_strided_slice %637 {offsets = [0, 0], sizes = [1, 256], strides = [1, 1]} : vector<2x256xf32> to vector<1x256xf32>
    %640 = vector.broadcast %639 : vector<1x256xf32> to vector<4x256xf32>
    %641 = arith.mulf %638, %640 : vector<4x256xf32>
    %642 = vector.extract_strided_slice %23 {offsets = [4, 0], sizes = [4, 256], strides = [1, 1]} : vector<8x256xf32> to vector<4x256xf32>
    %643 = vector.extract_strided_slice %637 {offsets = [1, 0], sizes = [1, 256], strides = [1, 1]} : vector<2x256xf32> to vector<1x256xf32>
    %644 = vector.broadcast %643 : vector<1x256xf32> to vector<4x256xf32>
    %645 = arith.mulf %642, %644 : vector<4x256xf32>
    %646 = tpu.concatenate %641, %645 in 0 : vector<4x256xf32>, vector<4x256xf32> -> vector<8x256xf32>
    %c0_67 = arith.constant 0 : index
    %c0_68 = arith.constant 0 : index
    %647 = vector.load %arg5[%c0_67, %c0_68] : memref<8x256xf32, #tpu.memory_space<vmem>>, vector<8x256xf32>
    tpu.vector_store %arg5[%c0_67, %c0_68], %646 {strides = array<i32>} : memref<8x256xf32, #tpu.memory_space<vmem>>, vector<8x256xf32>,
    return
  }
  func.func @transform_0(%arg0: i32) -> (i32, i32) {
    %c0_i32 = arith.constant 0 : i32
    %c0_i32_0 = arith.constant 0 : i32
    return %arg0, %c0_i32 : i32, i32
  }
  func.func @transform_1(%arg0: i32) -> (i32, i32) {
    %c0_i32 = arith.constant 0 : i32
    %c0_i32_0 = arith.constant 0 : i32
    %c0_i32_1 = arith.constant 0 : i32
    return %c0_i32, %c0_i32_0 : i32, i32
  }
  func.func @transform_2(%arg0: i32) -> (i32, i32) {
    %c0_i32 = arith.constant 0 : i32
    %c0_i32_0 = arith.constant 0 : i32
    %c0_i32_1 = arith.constant 0 : i32
    return %c0_i32, %c0_i32_0 : i32, i32
  }
  func.func @transform_3(%arg0: i32) -> i32 {
    %c0_i32 = arith.constant 0 : i32
    %c0_i32_0 = arith.constant 0 : i32
    return %c0_i32 : i32
  }
  func.func @transform_4(%arg0: i32) -> (i32, i32) {
    %c0_i32 = arith.constant 0 : i32
    %c0_i32_0 = arith.constant 0 : i32
    return %arg0, %c0_i32 : i32, i32
  }
}

</mosaic_0001>

<bundles_post_ra>
// kernel: cbam_pallas.1
= control target key start
LH: loop header
LB: loop body
LE: loop exit
PB: predicated region body
PF: predicated region fallthrough
CT: control target
= control target key end

     0   :  { %9 = vsyncpa [#allocation3], 0  ;;  %s1367_s18 = smov [#allocation2]   ;;  %s2824_s0 = inlined_call_operand.vmem [shape: f32[8,256], index: 0, kind: input, shape index: {}]   ;;  %s2825_s1 = inlined_call_operand.vmem [shape: f32[2,8], index: 1, kind: input, shape index: {}]   ;;  %s2826_s2 = inlined_call_operand.vmem [shape: f32[8,2], index: 2, kind: input, shape index: {}]   ;;  %s2827_s3 = inlined_call_operand.vmem [shape: f32[98], index: 3, kind: input, shape index: {}]   ;;  %s2828_s4 = inlined_call_operand.vmem [shape: f32[8,256], index: 4, kind: output, shape index: {}]  }
   0x1   :  { %s21_s17 = sshll.u32 %s2827_s3, 4  ;;  %s22_s17 = int_to_ptr.vmem [resolvable:$true] %s21_s17 }
   0x2   :  { %24 = dma.vmem_to_smem %s22_s17, 16, %s1367_s18, [#allocation3]  }
   0x3   :  { %1365 = dma.done.wait [#allocation3], 16  }
   0x4   :  { %1366 = vsyncadd [#allocation3], 4294967280 }
   0x5   :  { %29 = sfence }
   0x6   :  { %v1415_v0 = vld [vmem:[%s2824_s0] sm:$0xff]  ;;  %v1420_v1 = vld [vmem:[%s2824_s0 + $0x8] sm:$0xff]  ;;  %v1368_v4 = vmov 256.0   ;;  %vm46_vm1 = vcmask 7168   ;;  %vm50_vm2 = vcmask 64512   ;;  %vm79_vm3 = vcmask 1041408  }
   0x7   :  { %v32_v2 = vadd.f32 %v1420_v1, %v1415_v0  ;;  %v43_v3 = vmax.f32 %v1415_v0, %v1420_v1  ;;  %1337 = vrcp.f32 %v1368_v4  ;;  %v48_v14 = vld [vmem:[%s2825_s1] sm:$0x3]  ;;  %vm75_vm4 = vcmask 15360   ;;  %s1369_s25 = smov 127   ;;  %s1372_s1 = smov 32  }
   0x8   :  { %v49_v18 = vld [vmem:[%s2826_s2] sm:$0xff]  ;;  %v1370_v20 = vmov 0   ;;  %v1371_v36 = vmov 4.0   ;;  %vm134_vm9 = vcmask 1043456   ;;  %vm194_vm10 = vcmask 1047556   ;;  %s1373_s2 = smov 16  }
   0x9   :  { %33 = vadd.xlane.f32.xlu0 %v32_v2  ;;  %1335 = vset.pattern.permute.xlu1 %v1370_v20  ;;  %vm209_vm12 = vcmask 1040384   ;;  %vm214_vm13 = vcmask 1042432   ;;  %s1374_s26 = smov 48   ;;  %s1375_s27 = smov 112  }
   0xa   :  { %1336 = vset.pattern.permute.xlu0 %v1370_v20  ;;  %s1376_s28 = smov 96   ;;  %s1377_s29 = smov 3  }
   0xb   :  { %s1378_s30 = smov 2   ;;  %s1379_s5 = smov 80  }
   0xc   :  { %s1380_s6 = smov 125   ;;  %s1381_s7 = smov 126  }
   0xd   :  { %v1338_v5 = vpop.eup %1337  ;;  %s1382_s8 = smov 1   ;;  %s1798_s9 = sld [smem:[#allocation2 + $0x18]] }
   0xe   :  { %v36_v6 = vmul.f32 256.0, %v1338_v5  ;;  %vm40_vm0 = vweird.f32 %v1338_v5  ;;  %s1804_s10 = sld [smem:[#allocation2 + $0x49]] }
   0xf   :  { %s1811_s11 = sld [smem:[#allocation2 + $0x3]] }
  0x10   :  { %v37_v7 = vsub.f32 1.0, %v36_v6  ;;  %s1815_s12 = sld [smem:[#allocation2 + $0x34]] }
  0x11   :  { %44 = vmax.xlane.f32.xlu0 %v43_v3  ;;  %s1817_s13 = sld [smem:[#allocation2 + $0xa]] }
  0x12   :  { %v38_v8 = vmul.f32 %v1338_v5, %v37_v7  ;;  %s1821_s14 = sld [smem:[#allocation2 + $0x3b]] }
  0x13   :  { %s1823_s15 = sld [smem:[#allocation2 + $0x11]] }
  0x14   :  { %v39_v9 = vadd.f32 %v1338_v5, %v38_v8  ;;  %s1827_s16 = sld [smem:[#allocation2 + $0x42]] }
  0x15   :  { %s1220_s17 = sld [smem:[#allocation2 + $0x1]] }
  0x16   :  { %v41_v11 = vsel %vm40_vm0, %v1338_v5, %v39_v9  ;;  %s1221_s18 = sld [smem:[#allocation2 + $0x32]] }
  0x17   :  { %s1835_s19 = sld [smem:[#allocation2 + $0x2]] }
  0x18   :  { %s1837_s20 = sld [smem:[#allocation2 + $0x33]] }
  0x19   :  { %s1841_s21 = sld [smem:[#allocation2]] }
  0x1a   :  { %s1845_s22 = sld [smem:[#allocation2 + $0x31]] }
  0x1b   :  { %s1847_s0 = sld [smem:[#allocation2 + $0x1f]] }
  0x1c   :  { %s1857_s3 = sld [smem:[#allocation2 + $0x50]] }
  0x1d   :  { %s1859_s23 = sld [smem:[#allocation2 + $0x4]] }
  0x1e   :  { %s1863_s24 = sld [smem:[#allocation2 + $0x35]] }
  0x7c   :  { %v34_v10 = vpop.xlane.xlu0 %33 }
  0x7d   :  { %v42_v12 = vmul.f32 %v41_v11, %v34_v10 }
  0x84   :  { %v45_v13 = vpop.xlane.xlu0 %44 }
  0x85   :  { %v47_v15 = vsel %vm46_vm1, %v42_v12, %v45_v13 }
  0x86   :  { %69 = vmatpush.msra.mxu0 %v47_v15 }
  0x87   :  { %1197 = vmatmul.msk.f32.vlgmr.msra.gmra.mxu0 %vm50_vm2, %v48_v14 }
 0x104   :  { %v71_v16 = vpop.f32.mrf.mxu0 }
 0x105   :  { %v74_v17 = vmax.f32 %v71_v16, 0.0 }
 0x107   :  { %1198 = vmatpush.msk.msra.mxu1 %vm79_vm3, %v74_v17 }
 0x108   :  { %1199 = vmatmul.msk.f32.vlgmr.msra.gmra.mxu1 %vm75_vm4, %v49_v18 }
 0x185   :  { %v100_v19 = vpop.f32.mrf.mxu1 }
 0x186   :  { %104 = vrot.lane.b32.xlu1 %v100_v19, %s1369_s25 }
 0x1f8   :  { %v105_v21 = vpop.permute.xlu1 %104 }
 0x1f9   :  { %v107_v22 = vadd.f32 %v105_v21, %v100_v19 }
 0x1fb   :  { %v1200_v23 = vmul.f32 -1.442695, %v107_v22 }
 0x1fd   :  { %1339 = vpow2.f32 %v1200_v23 }
 0x203   :  { %v1340_v24 = vpop.eup %1339 }
 0x204   :  { %v111_v25 = vadd.f32 1.0, %v1340_v24 }
 0x206   :  { %1341 = vrcp.f32 %v111_v25  ;;  %v123_v29 = vand.u32 2147483648, %v111_v25  ;;  %v121_v31 = vand.u32 2147483647, %v111_v25  ;;  %vm117_vm6 = vweird.f32 %v111_v25 }
 0x207   :  { %1343 = vrcp.f32 %v1371_v36 }
 0x208   :  { %v124_v33 = vor.u32 1.1754944e-38, %v123_v29  ;;  %vm122_vm8 = vcmp.eq.f32.partialorder %v121_v31, 8.507059e+37 }
 0x20c   :  { %v1342_v26 = vpop.eup %1341 }
 0x20d   :  { %v113_v27 = vmul.f32 %v1342_v26, %v111_v25  ;;  %vm118_vm5 = vweird.f32 %v1342_v26  ;;  %v1344_v37 = vpop.eup %1343 }
 0x20e   :  { %vm119_vm7 = vmor %vm117_vm6, %vm118_vm5  ;;  %v150_v38 = vmul.f32 4.0, %v1344_v37  ;;  %vm154_vm11 = vweird.f32 %v1344_v37 }
 0x20f   :  { %v114_v28 = vsub.f32 1.0, %v113_v27 }
 0x210   :  { %v151_v42 = vsub.f32 1.0, %v150_v38 }
 0x211   :  { %v115_v30 = vmul.f32 %v1342_v26, %v114_v28 }
 0x212   :  { %v152_v63 = vmul.f32 %v1344_v37, %v151_v42 }
 0x213   :  { %v116_v32 = vadd.f32 %v1342_v26, %v115_v30 }
 0x214   :  { %v153_v18 = vadd.f32 %v1344_v37, %v152_v63 }
 0x215   :  { %v120_v34 = vsel %vm119_vm7, %v1342_v26, %v116_v32 }
 0x216   :  { %v125_v35 = vsel %vm122_vm8, %v124_v33, %v120_v34  ;;  %v155_v29 = vsel %vm154_vm11, %v1344_v37, %v153_v18 }
 0x217   :  { %129 = vperm.xlu1 %1335, %v125_v35  }
 0x289   :  { %v130_v39 = vpop.permute.xlu1 %129 }
 0x28a   :  { %v1435_v40 = vmul.f32 %v130_v39, %v1415_v0  ;;  %v1438_v41 = vmul.f32 %v130_v39, %v1420_v1 }
 0x28c   :  { %2854 = vst [vmem:[#allocation5_spill] sm:$0xff] %v1435_v40  ;;  %v135_v43 = vsel %vm134_vm9, %v1435_v40, 0.0  ;;  %v142_v44 = vsel %vm134_vm9, %v1438_v41, 0.0  ;;  %v158_v45 = vsel %vm134_vm9, %v1435_v40, -inf  ;;  %v165_v46 = vsel %vm134_vm9, %v1438_v41, -inf }
 0x28d   :  { %2855 = vst [vmem:[#allocation6_spill] sm:$0xff] %v1438_v41  ;;  %v136_v47 = vrot.slane %v135_v43, 4  ;;  %v143_v48 = vrot.slane %v142_v44, 4  ;;  %v159_v49 = vrot.slane %v158_v45, 4  ;;  %v166_v50 = vrot.slane %v165_v46, 4 }
 0x28e   :  { %v174_v51 = vrot.slane %v1435_v40, 4  ;;  %v175_v52 = vrot.slane %v1438_v41, 4  ;;  %v195_v53 = vsel %vm194_vm10, %v1435_v40, -inf  ;;  %v202_v54 = vsel %vm194_vm10, %v1438_v41, -inf }
 0x28f   :  { %v137_v55 = vadd.f32 %v136_v47, %v135_v43  ;;  %v144_v56 = vadd.f32 %v143_v48, %v142_v44  ;;  %v160_v57 = vmax.f32 %v158_v45, %v159_v49  ;;  %v167_v58 = vmax.f32 %v165_v46, %v166_v50 }
 0x290   :  { %v178_v59 = vsel %vm134_vm9, %v174_v51, 0.0  ;;  %v185_v60 = vsel %vm134_vm9, %v175_v52, 0.0  ;;  %v196_v61 = vrot.slane %v195_v53, 4  ;;  %v203_v62 = vrot.slane %v202_v54, 4 }
 0x291   :  { %v138_v0 = vrot.slane %v137_v55, 2  ;;  %v145_v1 = vrot.slane %v144_v56, 2  ;;  %v179_v2 = vrot.slane %v178_v59, 4  ;;  %v186_v3 = vrot.slane %v185_v60, 4 }
 0x292   :  { %v197_v4 = vmax.f32 %v195_v53, %v196_v61  ;;  %v204_v5 = vmax.f32 %v202_v54, %v203_v62  ;;  %v161_v8 = vrot.slane %v160_v57, 2  ;;  %v168_v9 = vrot.slane %v167_v58, 2 }
 0x293   :  { %v139_v6 = vadd.f32 %v138_v0, %v137_v55  ;;  %v146_v7 = vadd.f32 %v145_v1, %v144_v56  ;;  %v180_v10 = vadd.f32 %v179_v2, %v178_v59  ;;  %v187_v11 = vadd.f32 %v186_v3, %v185_v60 }
 0x294   :  { %v198_v12 = vrot.slane %v197_v4, 2  ;;  %v205_v13 = vrot.slane %v204_v5, 2  ;;  %v162_v19 = vmax.f32 %v160_v57, %v161_v8  ;;  %v169_v20 = vmax.f32 %v167_v58, %v168_v9 }
 0x295   :  { %v140_v14 = vrot.slane %v139_v6, 1  ;;  %v147_v15 = vrot.slane %v146_v7, 1  ;;  %v181_v16 = vrot.slane %v180_v10, 2  ;;  %v188_v17 = vrot.slane %v187_v11, 2 }
 0x296   :  { %v199_v23 = vmax.f32 %v197_v4, %v198_v12  ;;  %v206_v24 = vmax.f32 %v204_v5, %v205_v13  ;;  %v163_v30 = vrot.slane %v162_v19, 1  ;;  %v170_v31 = vrot.slane %v169_v20, 1 }
 0x297   :  { %v182_v21 = vadd.f32 %v181_v16, %v180_v10  ;;  %v189_v22 = vadd.f32 %v188_v17, %v187_v11  ;;  %v141_v25 = vadd.f32 %v140_v14, %v139_v6  ;;  %v148_v26 = vadd.f32 %v147_v15, %v146_v7 }
 0x298   :  { %v200_v34 = vrot.slane %v199_v23, 1  ;;  %v207_v35 = vrot.slane %v206_v24, 1  ;;  %v164_v43 = vmax.f32 %v162_v19, %v163_v30  ;;  %v171_v44 = vmax.f32 %v169_v20, %v170_v31 }
 0x299   :  { %v183_v27 = vrot.slane %v182_v21, 1  ;;  %v190_v28 = vrot.slane %v189_v22, 1  ;;  %v156_v36 = vmul.f32 %v155_v29, %v141_v25  ;;  %v157_v38 = vmul.f32 %v155_v29, %v148_v26 }
 0x29a   :  { %v201_v45 = vmax.f32 %v199_v23, %v200_v34  ;;  %v208_v46 = vmax.f32 %v206_v24, %v207_v35  ;;  %v217_v53 = vlaneseq }
 0x29b   :  { %v184_v32 = vadd.f32 %v183_v27, %v182_v21  ;;  %v191_v33 = vadd.f32 %v190_v28, %v189_v22 }
 0x29c   :  { %v1497_v54 = vand.u32 127, %v217_v53 }
 0x29d   :  { %v192_v39 = vmul.f32 %v184_v32, %v155_v29  ;;  %v193_v42 = vmul.f32 %v191_v33, %v155_v29  ;;  %v2829_v32 = vmov 0.0  }
 0x29e   :  { %vm301_vm14 = vcmp.lt.s32.totalorder %v1497_v54, 48  ;;  %vm427_vm15 = vcmp.lt.s32.totalorder %v1497_v54, 32  ;;  %vm547_vm0 = vcmp.lt.s32.totalorder %v1497_v54, 16  ;;  %vm778_vm1 = vcmp.lt.s32.totalorder %v1497_v54, 112 }
 0x29f   :  { %v210_v47 = vsel %vm209_vm12, %v156_v36, %v192_v39  ;;  %v211_v48 = vsel %vm209_vm12, %v157_v38, %v193_v42  ;;  %vm310_vm2 = vcmp.lt.s32.totalorder %v1497_v54, 3  ;;  %vm898_vm4 = vcmp.lt.s32.totalorder %v1497_v54, 96 }
 0x2a0   :  { %v212_v37 = vsel %vm79_vm3, %v210_v47, %v164_v43  ;;  %v213_v49 = vsel %vm79_vm3, %v211_v48, %v171_v44  ;;  %vm328_vm3 = vcmp.lt.s32.totalorder %v1497_v54, 2  ;;  %vm373_vm5 = vcmp.lt.s32.totalorder %v1497_v54, 127 }
 0x2a1   :  { %v1456_v50 = vsel %vm214_vm13, %v212_v37, %v201_v45  ;;  %v1458_v51 = vsel %vm214_vm13, %v213_v49, %v208_v46  ;;  %vm346_vm6 = vcmp.lt.s32.totalorder %v1497_v54, 1  ;;  %vm391_vm7 = vcmp.lt.s32.totalorder %v1497_v54, 126 }
 0x2a2   :  { %425 = vrot.lane.b32.xlu0 %v1458_v51, %s1372_s1  ;;  %543 = vrot.lane.b32.xlu1 %v1456_v50, %s1373_s2  ;;  %vm225_vm8 = vcmp.ge.s32.totalorder %v1497_v54, 48  ;;  %vm409_vm10 = vcmp.lt.s32.totalorder %v1497_v54, 125  ;;  %vm237_vm11 = vcmp.ge.s32.totalorder %v1497_v54, 32  ;;  %vm249_vm12 = vcmp.ge.s32.totalorder %v1497_v54, 16 }
 0x2a3   :  { %297 = vrot.lane.b32.xlu2 %v1456_v50, %s1374_s26  ;;  %v1201_v33 = vsel %vm225_vm8, 1.0, %v2829_v32  ;;  %v1204_v42 = vsel %vm237_vm11, 1.0, %v2829_v32  ;;  %v1207_v46 = vsel %vm249_vm12, 1.0, %v2829_v32  ;;  %vm1018_vm13 = vcmp.lt.s32.totalorder %v1497_v54, 80 }
 0x2aa   :  { %776 = vrot.lane.b32.xlu0 %v1458_v51, %s1375_s27  ;;  %894 = vrot.lane.b32.xlu1 %v1456_v50, %s1376_s28 }
 0x2ab   :  { %299 = vrot.lane.b32.xlu2 %v1458_v51, %s1374_s26  ;;  %s1880_s26 = sld [smem:[#allocation2 + $0x16]] }
 0x2b2   :  { %665 = vrot.lane.b32.xlu0 %v1458_v51, %s1377_s29  ;;  %682 = vrot.lane.b32.xlu1 %v1458_v51, %s1378_s30 }
 0x2b3   :  { %423 = vrot.lane.b32.xlu2 %v1456_v50, %s1372_s1  ;;  %s1869_s1 = sld [smem:[#allocation2 + $0x15]] }
 0x2ba   :  { %680 = vrot.lane.b32.xlu0 %v1456_v50, %s1378_s30  ;;  %1016 = vrot.lane.b32.xlu1 %v1458_v51, %s1379_s5 }
 0x2bb   :  { %545 = vrot.lane.b32.xlu2 %v1458_v51, %s1373_s2  ;;  %s1876_s2 = sld [smem:[#allocation2 + $0x46]] }
 0x2c2   :  { %1014 = vrot.lane.b32.xlu0 %v1456_v50, %s1379_s5  ;;  %725 = vrot.lane.b32.xlu1 %v1458_v51, %s1369_s25  ;;  %s1939_s5 = sld [smem:[#allocation2 + $0x5e]] }
 0x2c3   :  { %774 = vrot.lane.b32.xlu2 %v1456_v50, %s1375_s27  ;;  %s1889_s27 = sld [smem:[#allocation2 + $0x47]] }
 0x2ca   :  { %723 = vrot.lane.b32.xlu0 %v1456_v50, %s1369_s25  ;;  %757 = vrot.lane.b32.xlu1 %v1456_v50, %s1380_s6 }
 0x2cb   :  { %663 = vrot.lane.b32.xlu2 %v1456_v50, %s1377_s29 }
 0x2d2   :  { %742 = vrot.lane.b32.xlu0 %v1458_v51, %s1381_s7 }
 0x2d3   :  { %896 = vrot.lane.b32.xlu2 %v1458_v51, %s1376_s28  ;;  %s1901_s28 = sld [smem:[#allocation2 + $0x26]] }
 0x2db   :  { %697 = vrot.lane.b32.xlu2 %v1456_v50, %s1382_s8 }
 0x2e3   :  { %699 = vrot.lane.b32.xlu2 %v1458_v51, %s1382_s8 }
 0x2eb   :  { %740 = vrot.lane.b32.xlu2 %v1456_v50, %s1381_s7 }
 0x2f3   :  { %759 = vrot.lane.b32.xlu2 %v1458_v51, %s1380_s6 }
 0x2fd   :  { %v298_v52 = vpop.permute.xlu2 %297 }
 0x305   :  { %v300_v55 = vpop.permute.xlu2 %299 }
 0x306   :  { %v1500_v56 = vsel %vm301_vm14, %v298_v52, %v300_v55  ;;  %v1502_v57 = vsel %vm301_vm14, %v300_v55, %v298_v52 }
 0x307   :  { %389 = vrot.lane.b32.xlu2 %v1500_v56, %s1381_s7  ;;  %371 = vrot.lane.b32.xlu0 %v1500_v56, %s1369_s25  ;;  %v1639_v34 = vmul.f32 %v1201_v33, %v1502_v57 }
 0x308   :  { %308 = vrot.lane.b32.xlu1 %v1500_v56, %s1377_s29 }
 0x30d   :  { %v424_v58 = vpop.permute.xlu2 %423 }
 0x310   :  { %326 = vrot.lane.b32.xlu1 %v1500_v56, %s1378_s30 }
 0x314   :  { %v426_v59 = vpop.permute.xlu0 %425  ;;  %v544_v60 = vpop.permute.xlu1 %543 }
 0x315   :  { %v1514_v61 = vsel %vm427_vm15, %v424_v58, %v426_v59  ;;  %v1516_v62 = vsel %vm427_vm15, %v426_v59, %v424_v58  ;;  %v546_v63 = vpop.permute.xlu2 %545 }
 0x316   :  { %v1520_v0 = vsel %vm547_vm0, %v546_v63, %v544_v60  ;;  %468 = vrot.lane.b32.xlu0 %v1514_v61, %s1382_s8  ;;  %434 = vrot.lane.b32.xlu2 %v1514_v61, %s1377_s29  ;;  %v1542_v6 = vsel %vm547_vm0, %v544_v60, %v546_v63  ;;  %v1670_v43 = vmul.f32 %v1204_v42, %v1516_v62  ;;  %v1733_v60 = vadd.s32 128, %v1497_v54 }
 0x317   :  { %v1691_v47 = vmul.f32 %v1207_v46, %v1520_v0 }
 0x318   :  { %344 = vrot.lane.b32.xlu1 %v1500_v56, %s1382_s8  ;;  %vm262_vm14 = vcmp.lt.s32.totalorder %v1733_v60, 240  ;;  %vm274_vm15 = vcmp.lt.s32.totalorder %v1733_v60, 224  ;;  %vm286_vm0 = vcmp.lt.s32.totalorder %v1733_v60, 208 }
 0x319   :  { %v1210_v0 = vsel %vm262_vm14, 1.0, %v2829_v32 }
 0x31c   :  { %v777_v1 = vpop.permute.xlu0 %776  ;;  %v895_v3 = vpop.permute.xlu1 %894 }
 0x31d   :  { %v775_v2 = vpop.permute.xlu2 %774 }
 0x31e   :  { %v1531_v4 = vsel %vm778_vm1, %v777_v1, %v775_v2  ;;  %528 = vrot.lane.b32.xlu0 %v1514_v61, %s1380_s6  ;;  %494 = vrot.lane.b32.xlu2 %v1514_v61, %s1369_s25  ;;  %v1570_v15 = vsel %vm778_vm1, %v775_v2, %v777_v1 }
 0x320   :  { %407 = vrot.lane.b32.xlu1 %v1500_v56, %s1380_s6 }
 0x324   :  { %v666_v5 = vpop.permute.xlu0 %665  ;;  %v683_v10 = vpop.permute.xlu1 %682 }
 0x325   :  { %v664_v7 = vpop.permute.xlu2 %663 }
 0x326   :  { %v1546_v8 = vsel %vm310_vm2, %v664_v7, %v666_v5  ;;  %v1550_v9 = vsel %vm310_vm2, %v666_v5, %v664_v7  ;;  %588 = vrot.lane.b32.xlu2 %v1542_v6, %s1382_s8  ;;  %571 = vrot.lane.b32.xlu0 %v1542_v6, %s1378_s30 }
 0x328   :  { %451 = vrot.lane.b32.xlu1 %v1514_v61, %s1378_s30 }
 0x32c   :  { %v681_v11 = vpop.permute.xlu0 %680  ;;  %v1582_v17 = vpop.permute.xlu1 %1016 }
 0x32d   :  { %v1562_v12 = vsel %vm328_vm3, %v681_v11, %v683_v10  ;;  %v1566_v13 = vsel %vm328_vm3, %v683_v10, %v681_v11  ;;  %v897_v14 = vpop.permute.xlu2 %896  ;;  %v1213_v11 = vsel %vm274_vm15, 1.0, %v2829_v32 }
 0x32e   :  { %v1574_v16 = vsel %vm898_vm4, %v897_v14, %v895_v3  ;;  %631 = vrot.lane.b32.xlu0 %v1542_v6, %s1381_s7  ;;  %800 = vrot.lane.b32.xlu2 %v1570_v15, %s1378_s30  ;;  %v1604_v25 = vsel %vm898_vm4, %v895_v3, %v897_v14  ;;  %v1752_v3 = vmul.f32 %v1210_v0, %v1531_v4  ;;  %v1850_v0 = vshrl.u32 %v217_v53, 7 }
 0x32f   :  { %2857 = vst [vmem:[#allocation8_spill] sm:$0xff] %v1604_v25 }
 0x330   :  { %511 = vrot.lane.b32.xlu1 %v1514_v61, %s1381_s7  ;;  %vm219_vm1 = vcmp.lt.s32.totalorder %v1850_v0, 2 }
 0x334   :  { %v1584_v18 = vpop.permute.xlu0 %1014  ;;  %v726_v20 = vpop.permute.xlu1 %725 }
 0x335   :  { %v698_v19 = vpop.permute.xlu2 %697  ;;  %v1720_v57 = vsel %vm1018_vm13, %v1584_v18, %v1582_v17  ;;  %v1020_v33 = vsel %vm1018_vm13, %v1582_v17, %v1584_v18 }
 0x336   :  { %783 = vrot.lane.b32.xlu0 %v1570_v15, %s1377_s29  ;;  %860 = vrot.lane.b32.xlu2 %v1570_v15, %s1381_s7  ;;  %2864 = vst [vmem:[#allocation15_spill] sm:$0xff] %v1720_v57 }
 0x338   :  { %554 = vrot.lane.b32.xlu1 %v1542_v6, %s1377_s29 }
 0x33c   :  { %v724_v21 = vpop.permute.xlu0 %723  ;;  %v758_v35 = vpop.permute.xlu1 %757 }
 0x33d   :  { %v1596_v22 = vsel %vm373_vm5, %v724_v21, %v726_v20  ;;  %v1600_v23 = vsel %vm373_vm5, %v726_v20, %v724_v21  ;;  %v700_v24 = vpop.permute.xlu2 %699  ;;  %v1781_v20 = vmul.f32 %v1213_v11, %v1574_v16  ;;  %v1853_v11 = vand.u32 15, %v1733_v60 }
 0x33e   :  { %2856 = vst [vmem:[#allocation7_spill] sm:$0xff] %v1600_v23  ;;  %v1608_v26 = vsel %vm346_vm6, %v698_v19, %v700_v24  ;;  %v1612_v27 = vsel %vm346_vm6, %v700_v24, %v698_v19  ;;  %843 = vrot.lane.b32.xlu0 %v1570_v15, %s1369_s25  ;;  %920 = vrot.lane.b32.xlu2 %v1604_v25, %s1378_s30  ;;  %v1873_v60 = vand.u32 15, %v1497_v54 }
 0x33f   :  { %2858 = vst [vmem:[#allocation9_spill] sm:$0xff] %v1608_v26  ;;  %vm232_vm4 = vcmp.ge.s32.totalorder %v1853_v11, 3  ;;  %vm244_vm11 = vcmp.ge.s32.totalorder %v1853_v11, 2  ;;  %vm256_vm14 = vcmp.ge.s32.totalorder %v1853_v11, 1  ;;  %v837_v26 = vstv %s1857_s3  ;;  %s2126_s3 = sld [smem:[#allocation2 + $0x3d]] }
 0x340   :  { %2859 = vst [vmem:[#allocation10_spill] sm:$0xff] %v1612_v27  ;;  %614 = vrot.lane.b32.xlu1 %v1542_v6, %s1369_s25  ;;  %vm243_vm8 = vcmp.ge.s32.totalorder %v1873_v60, 2  ;;  %vm231_vm12 = vcmp.ge.s32.totalorder %v1873_v60, 3  ;;  %vm255_vm13 = vcmp.ge.s32.totalorder %v1873_v60, 1  ;;  %vm267_vm15 = vcmp.lt.s32.totalorder %v1873_v60, 15 }
 0x341   :  { %2869 = vst [vmem:[#allocation20_spill] sm:$0xff] %v1781_v20  ;;  %v688_v27 = vstv %s1880_s26  ;;  %s2213_s26 = sld [smem:[#allocation2 + $0xb]] }
 0x344   :  { %v743_v28 = vpop.permute.xlu0 %742 }
 0x345   :  { %v741_v29 = vpop.permute.xlu2 %740 }
 0x346   :  { %v1623_v30 = vsel %vm391_vm7, %v741_v29, %v743_v28  ;;  %v1627_v31 = vsel %vm391_vm7, %v743_v28, %v741_v29  ;;  %903 = vrot.lane.b32.xlu0 %v1604_v25, %s1377_s29  ;;  %980 = vrot.lane.b32.xlu2 %v1604_v25, %s1381_s7  ;;  %v1216_v29 = vsel %vm286_vm0, 1.0, %v2829_v32  ;;  %vm268_vm0 = vcmp.lt.s32.totalorder %v1853_v11, 15 }
 0x347   :  { %2860 = vst [vmem:[#allocation11_spill] sm:$0xff] %v1623_v30  ;;  %v1819_v42 = vmul.f32 %v1216_v29, %v1020_v33  ;;  %v333_v29 = vstv %s1220_s17  ;;  %v334_v33 = vstv %s1221_s18  ;;  %s1993_s17 = sld [smem:[#allocation2 + $0x4b]] }
 0x348   :  { %2861 = vst [vmem:[#allocation12_spill] sm:$0xff] %v1627_v31  ;;  %648 = vrot.lane.b32.xlu1 %v1542_v6, %s1380_s6  ;;  %v335_v41 = vsel %vm219_vm1, %v333_v29, %v334_v33  ;;  %v362_v29 = vstv %s1811_s11  ;;  %v363_v33 = vstv %s1815_s12  ;;  %s1966_s11 = sld [smem:[#allocation2 + $0x48]] }
 0x349   :  { %2872 = vst [vmem:[#allocation23_spill] sm:$0xff] %v1819_v42  ;;  %s1988_s12 = sld [smem:[#allocation2 + $0x1a]] }
 0x34a   :  { %s1999_s18 = sld [smem:[#allocation2 + $0x9]] }
 0x34d   :  { %v760_v36 = vpop.permute.xlu2 %759 }
 0x34e   :  { %v1643_v38 = vsel %vm409_vm10, %v758_v35, %v760_v36  ;;  %v1647_v39 = vsel %vm409_vm10, %v760_v36, %v758_v35  ;;  %963 = vrot.lane.b32.xlu0 %v1604_v25, %s1369_s25  ;;  %324 = vrot.lane.b32.xlu2 %v1639_v34, %s1378_s30 }
 0x34f   :  { %2862 = vst [vmem:[#allocation13_spill] sm:$0xff] %v1643_v38 }
 0x350   :  { %2863 = vst [vmem:[#allocation14_spill] sm:$0xff] %v1647_v39  ;;  %817 = vrot.lane.b32.xlu1 %v1570_v15, %s1382_s8 }
 0x356   :  { %306 = vrot.lane.b32.xlu0 %v1639_v34, %s1377_s29  ;;  %342 = vrot.lane.b32.xlu2 %v1639_v34, %s1382_s8 }
 0x358   :  { %877 = vrot.lane.b32.xlu1 %v1570_v15, %s1380_s6 }
 0x35e   :  { %405 = vrot.lane.b32.xlu0 %v1639_v34, %s1380_s6  ;;  %369 = vrot.lane.b32.xlu2 %v1639_v34, %s1369_s25 }
 0x360   :  { %937 = vrot.lane.b32.xlu1 %v1604_v25, %s1382_s8 }
 0x361   :  { %v1676_v44 = vpop.permute.xlu2 %389 }
 0x366   :  { %449 = vrot.lane.b32.xlu0 %v1670_v43, %s1378_s30  ;;  %466 = vrot.lane.b32.xlu2 %v1670_v43, %s1382_s8 }
 0x368   :  { %997 = vrot.lane.b32.xlu1 %v1604_v25, %s1380_s6 }
 0x36e   :  { %509 = vrot.lane.b32.xlu0 %v1670_v43, %s1381_s7  ;;  %526 = vrot.lane.b32.xlu2 %v1670_v43, %s1380_s6 }
 0x370   :  { %387 = vrot.lane.b32.xlu1 %v1639_v34, %s1381_s7  ;;  %v1687_v45 = vpop.permute.xlu2 %434 }
 0x376   :  { %552 = vrot.lane.b32.xlu0 %v1691_v47, %s1377_s29  ;;  %569 = vrot.lane.b32.xlu2 %v1691_v47, %s1378_s30 }
 0x378   :  { %432 = vrot.lane.b32.xlu1 %v1670_v43, %s1377_s29  ;;  %v1699_v48 = vpop.permute.xlu2 %494 }
 0x379   :  { %v1707_v49 = vpop.permute.xlu0 %371 }
 0x37a   :  { %v1701_v37 = vpop.permute.xlu1 %308 }
 0x37e   :  { %612 = vrot.lane.b32.xlu0 %v1691_v47, %s1369_s25  ;;  %629 = vrot.lane.b32.xlu2 %v1691_v47, %s1381_s7 }
 0x380   :  { %492 = vrot.lane.b32.xlu1 %v1670_v43, %s1369_s25  ;;  %v1711_v52 = vpop.permute.xlu2 %588 }
 0x382   :  { %v1714_v55 = vpop.permute.xlu1 %326 }
 0x386   :  { %1023 = vrot.lane.b32.xlu0 %v1720_v57, %s1377_s29  ;;  %1040 = vrot.lane.b32.xlu2 %v1720_v57, %s1378_s30 }
 0x388   :  { %586 = vrot.lane.b32.xlu1 %v1691_v47, %s1382_s8  ;;  %v1728_v58 = vpop.permute.xlu0 %468  ;;  %v1730_v59 = vpop.permute.xlu2 %800 }
 0x389   :  { %2865 = vst [vmem:[#allocation16_spill] sm:$0xff] %v1730_v59  ;;  %v2877_v59 = vmov 0.0  }
 0x38a   :  { %v1735_v62 = vpop.permute.xlu1 %344  ;;  %v1958_v25 = vsel %vm231_vm12, 1.0, %v2877_v59  ;;  %vm292_vm12 = vcmp.lt.s32.totalorder %v1853_v11, 13 }
 0x38e   :  { %1083 = vrot.lane.b32.xlu0 %v1720_v57, %s1369_s25  ;;  %1100 = vrot.lane.b32.xlu2 %v1720_v57, %s1381_s7 }
 0x390   :  { %1057 = vrot.lane.b32.xlu1 %v1720_v57, %s1382_s8  ;;  %v1744_v63 = vpop.permute.xlu0 %528  ;;  %v1747_v1 = vpop.permute.xlu2 %860 }
 0x391   :  { %2866 = vst [vmem:[#allocation17_spill] sm:$0xff] %v1747_v1  ;;  %v316_v1 = vstv %s1845_s22  ;;  %s2102_s22 = sld [smem:[#allocation2 + $0x39]] }
 0x392   :  { %v1749_v2 = vpop.permute.xlu1 %407 }
 0x396   :  { %802 = vrot.lane.b32.xlu0 %v1752_v3, %s1378_s30  ;;  %819 = vrot.lane.b32.xlu2 %v1752_v3, %s1382_s8 }
 0x398   :  { %646 = vrot.lane.b32.xlu1 %v1691_v47, %s1380_s6  ;;  %v1760_v5 = vpop.permute.xlu0 %571  ;;  %v1762_v7 = vpop.permute.xlu2 %920 }
 0x399   :  { %2867 = vst [vmem:[#allocation18_spill] sm:$0xff] %v1762_v7  ;;  %v315_v7 = vstv %s1841_s21  ;;  %s2087_s21 = sld [smem:[#allocation2 + $0x8]] }
 0x39a   :  { %v1764_v10 = vpop.permute.xlu1 %451 }
 0x39e   :  { %862 = vrot.lane.b32.xlu0 %v1752_v3, %s1381_s7  ;;  %879 = vrot.lane.b32.xlu2 %v1752_v3, %s1380_s6 }
 0x3a0   :  { %785 = vrot.lane.b32.xlu1 %v1752_v3, %s1377_s29  ;;  %v1773_v4 = vpop.permute.xlu0 %631  ;;  %v1776_v14 = vpop.permute.xlu2 %980 }
 0x3a1   :  { %2868 = vst [vmem:[#allocation19_spill] sm:$0xff] %v1776_v14  ;;  %v351_v14 = vstv %s1835_s19  ;;  %s2013_s19 = sld [smem:[#allocation2 + $0xd]] }
 0x3a2   :  { %v1778_v19 = vpop.permute.xlu1 %511 }
 0x3a6   :  { %922 = vrot.lane.b32.xlu0 %v1781_v20, %s1378_s30  ;;  %939 = vrot.lane.b32.xlu2 %v1781_v20, %s1382_s8 }
 0x3a8   :  { %845 = vrot.lane.b32.xlu1 %v1752_v3, %s1369_s25  ;;  %v1789_v21 = vpop.permute.xlu0 %783  ;;  %v325_v24 = vpop.permute.xlu2 %324 }
 0x3a9   :  { %2870 = vst [vmem:[#allocation21_spill] sm:$0xff] %v1789_v21  ;;  %v330_v40 = vsel %vm328_vm3, %v1714_v55, %v325_v24  ;;  %v1907_v21 = vsel %vm232_vm4, 1.0, %v2877_v59  ;;  %vm279_vm4 = vcmp.lt.s32.totalorder %v1873_v60, 14 }
 0x3aa   :  { %v1791_v28 = vpop.permute.xlu1 %554 }
 0x3ae   :  { %982 = vrot.lane.b32.xlu0 %v1781_v20, %s1381_s7  ;;  %999 = vrot.lane.b32.xlu2 %v1781_v20, %s1380_s6 }
 0x3b0   :  { %905 = vrot.lane.b32.xlu1 %v1781_v20, %s1377_s29  ;;  %v1802_v16 = vpop.permute.xlu0 %843  ;;  %v343_v36 = vpop.permute.xlu2 %342 }
 0x3b1   :  { %2871 = vst [vmem:[#allocation22_spill] sm:$0xff] %v1802_v16  ;;  %v347_v39 = vsel %vm346_vm6, %v343_v36, %v1735_v62  ;;  %v348_v38 = vsel %vm346_vm6, %v1735_v62, %v343_v36 }
 0x3b2   :  { %v1813_v35 = vpop.permute.xlu1 %614 }
 0x3b6   :  { %1042 = vrot.lane.b32.xlu0 %v1819_v42, %s1378_s30  ;;  %1059 = vrot.lane.b32.xlu2 %v1819_v42, %s1382_s8  ;;  %s1923_s30 = sld [smem:[#allocation2 + $0x2d]] }
 0x3b7   :  { %s1951_s8 = sld [smem:[#allocation2 + $0x4a]] }
 0x3b8   :  { %965 = vrot.lane.b32.xlu1 %v1781_v20, %s1369_s25  ;;  %v1833_v17 = vpop.permute.xlu0 %903  ;;  %v1843_v46 = vpop.permute.xlu2 %369 }
 0x3b9   :  { %2873 = vst [vmem:[#allocation24_spill] sm:$0xff] %v1833_v17  ;;  %v329_v17 = vsel %vm328_vm3, %v325_v24, %v1714_v55  ;;  %v336_v55 = vmul.f32 %v335_v41, %v330_v40  ;;  %v1928_v40 = vsel %vm243_vm8, 1.0, %v2877_v59  ;;  %vm280_vm8 = vcmp.lt.s32.totalorder %v1853_v11, 14 }
 0x3ba   :  { %v1839_v18 = vpop.permute.xlu1 %648 }
 0x3bb   :  { %2874 = vst [vmem:[#allocation25_spill] sm:$0xff] %v1839_v18  ;;  %v317_v18 = vsel %vm219_vm1, %v315_v7, %v316_v1  ;;  %v338_v30 = vmul.f32 %v1928_v40, %v336_v55 }
 0x3be   :  { %1102 = vrot.lane.b32.xlu0 %v1819_v42, %s1381_s7  ;;  %1119 = vrot.lane.b32.xlu2 %v1819_v42, %s1380_s6  ;;  %s1941_s7 = sld [smem:[#allocation2 + $0x19]] }
 0x3c0   :  { %1025 = vrot.lane.b32.xlu1 %v1819_v42, %s1377_s29  ;;  %v1867_v53 = vpop.permute.xlu0 %963  ;;  %v1911_v16 = vpop.permute.xlu2 %466  ;;  %s1913_s29 = sld [smem:[#allocation2 + $0x57]] }
 0x3c1   :  { %2875 = vst [vmem:[#allocation26_spill] sm:$0xff] %v1867_v53  ;;  %v352_v53 = vstv %s1837_s20  ;;  %s2081_s20 = sld [smem:[#allocation2 + $0x40]] }
 0x3c2   :  { %v1878_v32 = vpop.permute.xlu1 %817  ;;  %v353_v24 = vsel %vm219_vm1, %v351_v14, %v352_v53  ;;  %v378_v14 = vstv %s1859_s23  ;;  %s2146_s23 = sld [smem:[#allocation2 + $0x7]] }
 0x3c3   :  { %2876 = vst [vmem:[#allocation27_spill] sm:$0xff] %v1878_v32  ;;  %v337_v32 = vmul.f32 %v335_v41, %v329_v17  ;;  %v1933_v41 = vsel %vm244_vm11, 1.0, %v2877_v59  ;;  %v379_v17 = vstv %s1863_s24  ;;  %v354_v36 = vmul.f32 %v353_v24, %v348_v38  ;;  %s2152_s24 = sld [smem:[#allocation2 + $0x38]] }
 0x3c4   :  { %v355_v53 = vmul.f32 %v353_v24, %v347_v39  ;;  %v380_v38 = vsel %vm219_vm1, %v378_v14, %v379_v17  ;;  %v374_v39 = vsel %vm373_vm5, %v1843_v46, %v1707_v49  ;;  %v1986_v14 = vsel %vm256_vm14, 1.0, %v2877_v59 }
 0x3c5   :  { %v364_v17 = vsel %vm219_vm1, %v362_v29, %v363_v33  ;;  %vm291_vm11 = vcmp.lt.s32.totalorder %v1873_v60, 13 }
 0x3c8   :  { %1085 = vrot.lane.b32.xlu1 %v1819_v42, %s1369_s25  ;;  %v307_v62 = vpop.permute.xlu0 %306  ;;  %s1960_s25 = sld [smem:[#allocation2 + $0x17]] }
 0x3c9   :  { %v311_v1 = vsel %vm310_vm2, %v307_v62, %v1701_v37  ;;  %v312_v7 = vsel %vm310_vm2, %v1701_v37, %v307_v62  ;;  %v339_v37 = vmul.f32 %v1933_v41, %v337_v32  ;;  %v1981_v32 = vsel %vm255_vm13, 1.0, %v2877_v59 }
 0x3ca   :  { %v1953_v42 = vpop.permute.xlu1 %877  ;;  %v318_v31 = vmul.f32 %v317_v18, %v312_v7  ;;  %v319_v20 = vmul.f32 %v317_v18, %v311_v1  ;;  %v375_v18 = vsel %vm373_vm5, %v1707_v49, %v1843_v46  ;;  %v717_v49 = vstv %s1804_s10  ;;  %s2001_s10 = sld [smem:[#allocation2 + $0x3a]] }
 0x3cb   :  { %2878 = vst [vmem:[#allocation28_spill] sm:$0xff] %v1953_v42  ;;  %v381_v1 = vmul.f32 %v380_v38, %v374_v39  ;;  %v382_v7 = vmul.f32 %v380_v38, %v375_v18  ;;  %v365_v38 = vmul.f32 %v364_v17, %v1639_v34  ;;  %v366_v39 = vmul.f32 %v364_v17, %v1500_v56 }
 0x3cc   :  { %v320_v24 = vmul.f32 %v1958_v25, %v318_v31  ;;  %v321_v55 = vmul.f32 %v1907_v21, %v319_v20  ;;  %v356_v31 = vmul.f32 %v1981_v32, %v354_v36  ;;  %v357_v20 = vmul.f32 %v1986_v14, %v355_v53  ;;  %v2003_v36 = vpop.permute.xlu2 %526 }
 0x3cd   :  { %v2879_v53 = vstv %s1798_s9  ;;  %v485_v18 = vstv %s1817_s13  ;;  %v605_v56 = vstv %s1823_s15  ;;  %v606_v17 = vstv %s1827_s16  ;;  %s2037_s9 = sld [smem:[#allocation2 + $0x6]] }
 0x3ce   :  { %v340_v46 = vadd.f32 %v338_v30, %v320_v24  ;;  %v341_v62 = vadd.f32 %v339_v37, %v321_v55  ;;  %v718_v37 = vsel %vm219_vm1, %v2879_v53, %v717_v49  ;;  %v486_v24 = vstv %s1821_s14  ;;  %s2041_s13 = sld [smem:[#allocation2 + $0x37]] }
 0x3cf   :  { %v2022_v55 = vsel %vm267_vm15, 1.0, %v2877_v59  ;;  %v2027_v49 = vsel %vm268_vm0, 1.0, %v2877_v59  ;;  %v671_v53 = vstv %s1869_s1  ;;  %v836_v42 = vstv %s1847_s0  ;;  %s2047_s14 = sld [smem:[#allocation2 + $0x5]] }
 0x3d0   :  { %v358_v29 = vadd.f32 %v356_v31, %v340_v46  ;;  %v359_v33 = vadd.f32 %v357_v20, %v341_v62  ;;  %1117 = vrot.lane.b32.xlu1 %v1720_v57, %s1380_s6  ;;  %v2007_v30 = vpop.permute.xlu0 %405  ;;  %s2029_s6 = sld [smem:[#allocation2 + $0x3e]]  ;;  %v383_v31 = vmul.f32 %v2022_v55, %v381_v1  ;;  %v384_v20 = vmul.f32 %v2027_v49, %v382_v7 }
 0x3d1   :  { %v672_v57 = vstv %s1876_s2  ;;  %s2053_s15 = sld [smem:[#allocation2 + $0x36]]  ;;  %v2064_v23 = vmul.f32 %v718_v37, %v1458_v51  ;;  %v410_v60 = vsel %vm409_vm10, %v2007_v30, %v1749_v2  ;;  %v411_v11 = vsel %vm409_vm10, %v1749_v2, %v2007_v30 }
 0x3d2   :  { %v2031_v34 = vpop.permute.xlu1 %937  ;;  %v367_v46 = vadd.f32 %v365_v38, %v358_v29  ;;  %v368_v62 = vadd.f32 %v366_v39, %v359_v33  ;;  %v487_v29 = vsel %vm219_vm1, %v485_v18, %v486_v24  ;;  %v956_v33 = vstv %s1901_s28  ;;  %s2059_s16 = sld [smem:[#allocation2 + $0xf]] }
 0x3d3   :  { %2880 = vst [vmem:[#allocation29_spill] sm:$0xff] %v2031_v34  ;;  %v689_v34 = vstv %s1889_s27  ;;  %v957_v38 = vstv %s1913_s29  ;;  %v607_v39 = vsel %vm219_vm1, %v605_v56, %v606_v17  ;;  %v731_v24 = vstv %s1941_s7  ;;  %s2112_s0 = sld [smem:[#allocation2 + $0xc]] }
 0x3d4   :  { %v2049_v1 = vadd.f32 %v383_v31, %v367_v46  ;;  %v2051_v7 = vadd.f32 %v384_v20, %v368_v62  ;;  %2881 = vst [vmem:[#allocation30_spill] sm:$0xff] %v2064_v23  ;;  %v2067_v31 = vmul.f32 %v718_v37, %v1456_v50  ;;  %v838_v20 = vsel %vm219_vm1, %v836_v42, %v837_v26  ;;  %s2195_s1 = sld [smem:[#allocation2 + $0xe]] }
 0x3d5   :  { %v2073_v46 = vsel %vm219_vm1, %v671_v53, %v672_v57  ;;  %v2077_v18 = vsel %vm219_vm1, %v688_v27, %v689_v34  ;;  %v732_v56 = vstv %s1951_s8  ;;  %v705_v50 = vstv %s1960_s25  ;;  %v2098_v57 = vpop.permute.xlu2 %569  ;;  %s2201_s2 = sld [smem:[#allocation2 + $0x3f]] }
 0x3d6   :  { %2882 = vst [vmem:[#allocation31_spill] sm:$0xff] %v2067_v31  ;;  %v706_v37 = vstv %s1966_s11  ;;  %v2090_v26 = vmul.f32 %v487_v29, %v1514_v61  ;;  %v2094_v27 = vsel %vm219_vm1, %v956_v33, %v957_v38  ;;  %v2105_v34 = vmul.f32 %v607_v39, %v1542_v6  ;;  %s2219_s27 = sld [smem:[#allocation2 + $0x3c]] }
 0x3d7   :  { %2883 = vst [vmem:[#allocation32_spill] sm:$0xff] %v2094_v27  ;;  %v2110_v17 = vsel %vm219_vm1, %v731_v24, %v732_v56  ;;  %v2115_v62 = vmul.f32 %v487_v29, %v1670_v43  ;;  %v2118_v53 = vmul.f32 %v607_v39, %v1691_v47  ;;  %v2123_v6 = vsel %vm219_vm1, %v705_v50, %v706_v37  ;;  %s2239_s28 = sld [smem:[#allocation2 + $0x12]] }
 0x3d8   :  { %v2083_v51 = vpop.permute.xlu0 %449  ;;  %2885 = vst [vmem:[#allocation34_spill] sm:$0xff] %v2105_v34  ;;  %v2129_v24 = vmul.f32 %v838_v20, %v1570_v15  ;;  %v2132_v43 = vmul.f32 %v838_v20, %v1752_v3  ;;  %v2137_v47 = vsel %vm279_vm4, 1.0, %v2877_v59  ;;  %v2142_v29 = vsel %vm280_vm8, 1.0, %v2877_v59  ;;  %s2245_s29 = sld [smem:[#allocation2 + $0x43]] }
 0x3d9   :  { %2886 = vst [vmem:[#allocation35_spill] sm:$0xff] %v2118_v53  ;;  %v414_v39 = vstv %s2037_s9  ;;  %v415_v56 = vstv %s2041_s13  ;;  %v396_v15 = vstv %s2047_s14  ;;  %v397_v3 = vstv %s2053_s15  ;;  %s2263_s7 = sld [smem:[#allocation2 + $0x10]] }
 0x3da   :  { %v2100_v42 = vpop.permute.xlu1 %997  ;;  %2887 = vst [vmem:[#allocation36_spill] sm:$0xff] %v2123_v6  ;;  %v474_v20 = vstv %s1999_s18  ;;  %v475_v50 = vstv %s2001_s10  ;;  %v534_v37 = vstv %s2013_s19  ;;  %v535_v61 = vstv %s2029_s6  ;;  %s2267_s8 = sld [smem:[#allocation2 + $0x41]] }
 0x3db   :  { %2884 = vst [vmem:[#allocation33_spill] sm:$0xff] %v2100_v42  ;;  %v416_v38 = vsel %vm219_vm1, %v414_v39, %v415_v56  ;;  %v2173_v33 = vmul.f32 %v2073_v46, %v1550_v9  ;;  %v2176_v39 = vsel %vm291_vm11, 1.0, %v2877_v59  ;;  %v2179_v56 = vsel %vm292_vm12, 1.0, %v2877_v59  ;;  %s2269_s25 = sld [smem:[#allocation2 + $0x13]] }
 0x3dc   :  { %2888 = vst [vmem:[#allocation37_spill] sm:$0xff] %v2129_v24  ;;  %v476_v2 = vsel %vm219_vm1, %v474_v20, %v475_v50  ;;  %v536_v30 = vsel %vm219_vm1, %v534_v37, %v535_v61  ;;  %v577_v24 = vstv %s2059_s16  ;;  %v578_v23 = vstv %s2081_s20  ;;  %s2283_s11 = sld [smem:[#allocation2 + $0x44]] }
 0x3dd   :  { %2889 = vst [vmem:[#allocation38_spill] sm:$0xff] %v2132_v43  ;;  %v398_v43 = vsel %vm219_vm1, %v396_v15, %v397_v3  ;;  %v417_v31 = vmul.f32 %v416_v38, %v410_v60  ;;  %v418_v27 = vmul.f32 %v416_v38, %v411_v11  ;;  %v457_v61 = vstv %s2087_s21  ;;  %v2199_v20 = vpop.permute.xlu2 %629  ;;  %s2317_s18 = sld [smem:[#allocation2 + $0x1b]] }
 0x3de   :  { %v458_v3 = vstv %s2102_s22  ;;  %v470_v38 = vsel %vm346_vm6, %v1911_v16, %v1728_v58  ;;  %v517_v60 = vstv %s2112_s0  ;;  %v518_v11 = vstv %s2126_s3  ;;  %s2323_s10 = sld [smem:[#allocation2 + $0x4c]] }
 0x3df   :  { %v419_v6 = vmul.f32 %v2176_v39, %v417_v31  ;;  %v420_v34 = vmul.f32 %v2179_v56, %v418_v27  ;;  %v2225_v53 = vsel %vm219_vm1, %v577_v24, %v578_v23  ;;  %v478_v24 = vmul.f32 %v476_v2, %v470_v38  ;;  %s2355_s19 = sld [smem:[#allocation2 + $0x1e]] }
 0x3e0   :  { %v2169_v42 = vpop.permute.xlu0 %509  ;;  %s2363_s6 = sld [smem:[#allocation2 + $0x14]] }
 0x3e1   :  { %s2373_s9 = sld [smem:[#allocation2 + $0x45]] }
 0x3e2   :  { %v388_v9 = vpop.permute.xlu1 %387  ;;  %s2377_s13 = sld [smem:[#allocation2 + $0x4f]] }
 0x3e3   :  { %v392_v59 = vsel %vm391_vm7, %v388_v9, %v1676_v44  ;;  %v393_v15 = vsel %vm391_vm7, %v1676_v44, %v388_v9  ;;  %v471_v44 = vsel %vm346_vm6, %v1728_v58, %v1911_v16  ;;  %v459_v58 = vsel %vm219_vm1, %v457_v61, %v458_v3  ;;  %s2381_s14 = sld [smem:[#allocation2 + $0x22]] }
 0x3e4   :  { %v399_v50 = vmul.f32 %v398_v43, %v392_v59  ;;  %v400_v37 = vmul.f32 %v398_v43, %v393_v15  ;;  %v440_v59 = vstv %s2146_s23  ;;  %v441_v15 = vstv %s2152_s24  ;;  %s2395_s15 = sld [smem:[#allocation2 + $0x53]] }
 0x3e5   :  { %v453_v16 = vsel %vm328_vm3, %v2083_v51, %v1764_v10  ;;  %v477_v23 = vmul.f32 %v476_v2, %v471_v44  ;;  %v519_v61 = vsel %vm219_vm1, %v517_v60, %v518_v11  ;;  %v442_v3 = vsel %vm219_vm1, %v440_v59, %v441_v15  ;;  %s2422_s16 = sld [smem:[#allocation2 + $0x1d]] }
 0x3e6   :  { %v401_v9 = vmul.f32 %v2137_v47, %v399_v50  ;;  %v402_v43 = vmul.f32 %v2142_v29, %v400_v37  ;;  %v454_v50 = vsel %vm328_vm3, %v1764_v10, %v2083_v51  ;;  %v530_v10 = vsel %vm409_vm10, %v2003_v36, %v1744_v63  ;;  %s2430_s20 = sld [smem:[#allocation2 + $0x4e]] }
 0x3e7   :  { %v460_v38 = vmul.f32 %v459_v58, %v454_v50  ;;  %v461_v44 = vmul.f32 %v459_v58, %v453_v16  ;;  %v560_v59 = vstv %s2195_s1  ;;  %v561_v15 = vstv %s2201_s2  ;;  %v2271_v58 = vpop.permute.xlu2 %1040  ;;  %s2434_s21 = sld [smem:[#allocation2 + $0x29]] }
 0x3e8   :  { %v403_v31 = vadd.f32 %v401_v9, %v2049_v1  ;;  %v404_v27 = vadd.f32 %v402_v43, %v2051_v7  ;;  %v553_v37 = vpop.permute.xlu0 %552  ;;  %v531_v1 = vsel %vm409_vm10, %v1744_v63, %v2003_v36  ;;  %v479_v63 = vmul.f32 %v1981_v32, %v477_v23  ;;  %s2443_s22 = sld [smem:[#allocation2 + $0x5a]] }
 0x3e9   :  { %v480_v36 = vmul.f32 %v1986_v14, %v478_v24  ;;  %v500_v50 = vstv %s2213_s26  ;;  %v463_v23 = vmul.f32 %v1933_v41, %v461_v44  ;;  %v562_v24 = vsel %vm219_vm1, %v560_v59, %v561_v15  ;;  %s2469_s0 = sld [smem:[#allocation2 + $0x1c]] }
 0x3ea   :  { %v433_v7 = vpop.permute.xlu1 %432  ;;  %v421_v51 = vadd.f32 %v419_v6, %v403_v31  ;;  %v422_v2 = vadd.f32 %v420_v34, %v404_v27  ;;  %v537_v34 = vmul.f32 %v536_v30, %v530_v10  ;;  %v538_v6 = vmul.f32 %v536_v30, %v531_v1  ;;  %s2475_s3 = sld [smem:[#allocation2 + $0x4d]] }
 0x3eb   :  { %v436_v60 = vsel %vm310_vm2, %v433_v7, %v1687_v45  ;;  %v437_v11 = vsel %vm310_vm2, %v1687_v45, %v433_v7  ;;  %v501_v31 = vstv %s2219_s27  ;;  %v573_v27 = vsel %vm328_vm3, %v2098_v57, %v1760_v5  ;;  %s2487_s23 = sld [smem:[#allocation2 + $0x21]] }
 0x3ec   :  { %v443_v9 = vmul.f32 %v442_v3, %v437_v11  ;;  %v444_v43 = vmul.f32 %v442_v3, %v436_v60  ;;  %v462_v30 = vmul.f32 %v1928_v40, %v460_v38  ;;  %v513_v3 = vsel %vm391_vm7, %v2169_v42, %v1778_v19  ;;  %s2491_s24 = sld [smem:[#allocation2 + $0x52]] }
 0x3ed   :  { %v514_v10 = vsel %vm391_vm7, %v1778_v19, %v2169_v42  ;;  %v574_v44 = vsel %vm328_vm3, %v1760_v5, %v2098_v57  ;;  %v502_v60 = vsel %vm219_vm1, %v500_v50, %v501_v31  ;;  %v620_v11 = vstv %s2239_s28  ;;  %s2502_s1 = sld [smem:[#allocation2 + $0x2c]] }
 0x3ee   :  { %v445_v45 = vmul.f32 %v1958_v25, %v443_v9  ;;  %v446_v16 = vmul.f32 %v1907_v21, %v444_v43  ;;  %v621_v9 = vstv %s2245_s29  ;;  %v556_v19 = vsel %vm310_vm2, %v553_v37, %v1791_v28  ;;  %s2511_s2 = sld [smem:[#allocation2 + $0x5d]] }
 0x3ef   :  { %v557_v42 = vsel %vm310_vm2, %v1791_v28, %v553_v37  ;;  %v521_v5 = vmul.f32 %v519_v61, %v514_v10  ;;  %v594_v28 = vstv %s2263_s7  ;;  %v595_v37 = vstv %s2267_s8  ;;  %s2520_s26 = sld [smem:[#allocation2 + $0x20]] }
 0x3f0   :  { %v447_v1 = vadd.f32 %v445_v45, %v421_v51  ;;  %v448_v7 = vadd.f32 %v446_v16, %v422_v2  ;;  %v613_v38 = vpop.permute.xlu0 %612  ;;  %v520_v2 = vmul.f32 %v519_v61, %v513_v3  ;;  %s2531_s27 = sld [smem:[#allocation2 + $0x51]] }
 0x3f1   :  { %s2537_s28 = sld [smem:[#allocation2 + $0x24]] }
 0x3f2   :  { %v464_v43 = vadd.f32 %v462_v30, %v447_v1  ;;  %v465_v59 = vadd.f32 %v463_v23, %v448_v7  ;;  %v493_v51 = vpop.permute.xlu1 %492  ;;  %v563_v30 = vmul.f32 %v562_v24, %v557_v42  ;;  %v564_v23 = vmul.f32 %v562_v24, %v556_v19  ;;  %s2547_s29 = sld [smem:[#allocation2 + $0x55]] }
 0x3f3   :  { %v496_v57 = vsel %vm373_vm5, %v493_v51, %v1699_v48  ;;  %v497_v15 = vsel %vm373_vm5, %v1699_v48, %v493_v51  ;;  %v637_v1 = vstv %s2269_s25  ;;  %v638_v24 = vstv %s2283_s11  ;;  %s2557_s7 = sld [smem:[#allocation2 + $0x23]] }
 0x3f4   :  { %v481_v45 = vadd.f32 %v479_v63, %v464_v43  ;;  %v482_v16 = vadd.f32 %v480_v36, %v465_v59  ;;  %v503_v50 = vmul.f32 %v502_v60, %v496_v57  ;;  %v504_v31 = vmul.f32 %v502_v60, %v497_v15  ;;  %v2331_v43 = vpop.permute.xlu2 %1100  ;;  %s2566_s8 = sld [smem:[#allocation2 + $0x54]] }
 0x3f5   :  { %v539_v63 = vmul.f32 %v2176_v39, %v537_v34  ;;  %v540_v36 = vmul.f32 %v2179_v56, %v538_v6  ;;  %v522_v7 = vmul.f32 %v2137_v47, %v520_v2  ;;  %v523_v60 = vmul.f32 %v2142_v29, %v521_v5  ;;  %s2604_s25 = sld [smem:[#allocation2 + $0x28]] }
 0x3f6   :  { %v490_v61 = vadd.f32 %v2115_v62, %v481_v45  ;;  %v491_v3 = vadd.f32 %v2090_v26, %v482_v16  ;;  %v505_v10 = vmul.f32 %v2022_v55, %v503_v50  ;;  %v506_v48 = vmul.f32 %v2027_v49, %v504_v31  ;;  %s2610_s11 = sld [smem:[#allocation2 + $0x59]] }
 0x3f7   :  { %v580_v19 = vmul.f32 %v2225_v53, %v574_v44  ;;  %v581_v42 = vmul.f32 %v2225_v53, %v573_v27  ;;  %v622_v34 = vsel %vm219_vm1, %v620_v11, %v621_v9  ;;  %v596_v6 = vsel %vm219_vm1, %v594_v28, %v595_v37 }
 0x3f8   :  { %v507_v62 = vadd.f32 %v505_v10, %v490_v61  ;;  %v508_v26 = vadd.f32 %v506_v48, %v491_v3  ;;  %v2333_v59 = vpop.permute.xlu0 %1023  ;;  %v565_v51 = vmul.f32 %v1958_v25, %v563_v30  ;;  %v566_v2 = vmul.f32 %v1907_v21, %v564_v23 }
 0x3f9   :  { %v616_v45 = vsel %vm373_vm5, %v613_v38, %v1813_v35  ;;  %v617_v53 = vsel %vm373_vm5, %v1813_v35, %v613_v38  ;;  %v675_v31 = vmul.f32 %v2073_v46, %v1546_v8  ;;  %v582_v35 = vmul.f32 %v1928_v40, %v580_v19 }
 0x3fa   :  { %v524_v5 = vadd.f32 %v522_v7, %v507_v62  ;;  %v525_v57 = vadd.f32 %v523_v60, %v508_v26  ;;  %v587_v15 = vpop.permute.xlu1 %586  ;;  %v583_v38 = vmul.f32 %v1933_v41, %v581_v42  ;;  %v639_v30 = vsel %vm219_vm1, %v637_v1, %v638_v24 }
 0x3fb   :  { %v590_v27 = vsel %vm346_vm6, %v587_v15, %v1711_v52  ;;  %v591_v44 = vsel %vm346_vm6, %v1711_v52, %v587_v15  ;;  %v633_v52 = vsel %vm391_vm7, %v2199_v20, %v1773_v4  ;;  %v634_v23 = vsel %vm391_vm7, %v1773_v4, %v2199_v20 }
 0x3fc   :  { %v541_v11 = vadd.f32 %v539_v63, %v524_v5  ;;  %v542_v9 = vadd.f32 %v540_v36, %v525_v57  ;;  %v597_v16 = vmul.f32 %v596_v6, %v591_v44  ;;  %v598_v50 = vmul.f32 %v596_v6, %v590_v27  ;;  %v2402_v42 = vpop.permute.xlu2 %819  ;;  %v2892_v57 = vld [vmem:[#allocation7_spill] sm:$0xff] }
 0x3fd   :  { %v765_v28 = vstv %s2317_s18  ;;  %v766_v37 = vstv %s2323_s10  ;;  %v623_v61 = vmul.f32 %v622_v34, %v616_v45  ;;  %v624_v3 = vmul.f32 %v622_v34, %v617_v53  ;;  %v2893_v27 = vld [vmem:[#allocation35_spill] sm:$0xff]  ;;  %s2618_s18 = sld [smem:[#allocation2 + $0x27]] }
 0x3fe   :  { %v567_v8 = vadd.f32 %v565_v51, %v541_v11  ;;  %v568_v46 = vadd.f32 %v566_v2, %v542_v9  ;;  %v599_v63 = vmul.f32 %v1981_v32, %v597_v16  ;;  %v600_v36 = vmul.f32 %v1986_v14, %v598_v50  ;;  %v2894_v11 = vld [vmem:[#allocation34_spill] sm:$0xff]  ;;  %v2897_v16 = vld [vmem:[#allocation9_spill] sm:$0xff]  ;;  %s2628_s10 = sld [smem:[#allocation2 + $0x58]] }
 0x3ff   :  { %v2387_v20 = vmul.f32 %v1958_v25, %v2173_v33  ;;  %v2890_v1 = vstv %s1993_s17  ;;  %v2891_v24 = vstv %s1988_s12  ;;  %v640_v60 = vmul.f32 %v639_v30, %v633_v52  ;;  %s2406_s12 = sld [smem:[#allocation2 + $0x25]]  ;;  %v2895_v9 = vld [vmem:[#allocation10_spill] sm:$0xff] }
 0x400   :  { %v584_v10 = vadd.f32 %v582_v35, %v567_v8  ;;  %v585_v48 = vadd.f32 %v583_v38, %v568_v46  ;;  %v2383_v4 = vpop.permute.xlu0 %1083  ;;  %v750_v7 = vsel %vm219_vm1, %v2891_v24, %v2890_v1  ;;  %v641_v62 = vmul.f32 %v639_v30, %v634_v23  ;;  %s2416_s17 = sld [smem:[#allocation2 + $0x56]]  ;;  %v2898_v8 = vld [vmem:[#allocation11_spill] sm:$0xff] }
 0x401   :  { %v2398_v26 = vmul.f32 %v1907_v21, %v675_v31  ;;  %v767_v19 = vsel %vm219_vm1, %v765_v28, %v766_v37  ;;  %v691_v51 = vmul.f32 %v2077_v18, %v1566_v13  ;;  %v692_v2 = vmul.f32 %v2077_v18, %v1562_v12  ;;  %v2896_v12 = vld [vmem:[#allocation36_spill] sm:$0xff] }
 0x402   :  { %v601_v34 = vadd.f32 %v599_v63, %v584_v10  ;;  %v602_v33 = vadd.f32 %v600_v36, %v585_v48  ;;  %v2404_v6 = vpop.permute.xlu1 %1057  ;;  %v734_v5 = vmul.f32 %v2110_v17, %v1596_v22  ;;  %v735_v15 = vmul.f32 %v2110_v17, %v2892_v57  ;;  %v2899_v28 = vld [vmem:[#allocation8_spill] sm:$0xff] }
 0x403   :  { %v625_v45 = vmul.f32 %v2022_v55, %v623_v61  ;;  %v626_v53 = vmul.f32 %v2027_v49, %v624_v3  ;;  %v708_v18 = vmul.f32 %v2896_v12, %v2895_v9  ;;  %v709_v22 = vmul.f32 %v2896_v12, %v2897_v16  ;;  %v2900_v37 = vld [vmem:[#allocation32_spill] sm:$0xff]  ;;  %v2905_v12 = vld [vmem:[#allocation14_spill] sm:$0xff] }
 0x404   :  { %v610_v44 = vadd.f32 %v2893_v27, %v601_v34  ;;  %v611_v13 = vadd.f32 %v2894_v11, %v602_v33  ;;  %v642_v17 = vmul.f32 %v2137_v47, %v640_v60  ;;  %v643_v50 = vmul.f32 %v2142_v29, %v641_v62  ;;  %v2901_v36 = vld [vmem:[#allocation20_spill] sm:$0xff]  ;;  %v2903_v27 = vld [vmem:[#allocation25_spill] sm:$0xff] }
 0x405   :  { %v654_v31 = vstv %s2363_s6  ;;  %v655_v35 = vstv %s2373_s9  ;;  %v2437_v52 = vmul.f32 %v1928_v40, %v691_v51  ;;  %v2440_v23 = vmul.f32 %v1933_v41, %v692_v2  ;;  %s2649_s6 = sld [smem:[#allocation2 + $0x5c]] }
 0x406   :  { %v627_v38 = vadd.f32 %v625_v45, %v610_v44  ;;  %v628_v30 = vadd.f32 %v626_v53, %v611_v13  ;;  %v751_v46 = vmul.f32 %v750_v7, %v2898_v8  ;;  %v2447_v61 = vmul.f32 %v2900_v37, %v2899_v28  ;;  %v2904_v13 = vld [vmem:[#allocation13_spill] sm:$0xff]  ;;  %s2651_s9 = sld [smem:[#allocation2 + $0x2a]] }
 0x407   :  { %v2450_v3 = vmul.f32 %v2022_v55, %v734_v5  ;;  %v2456_v1 = vmul.f32 %v2900_v37, %v2901_v36  ;;  %v2459_v24 = vmul.f32 %v2027_v49, %v735_v15  ;;  %v2462_v60 = vmul.f32 %v1981_v32, %v708_v18  ;;  %v2902_v15 = vld [vmem:[#allocation12_spill] sm:$0xff] }
 0x408   :  { %v644_v10 = vadd.f32 %v642_v17, %v627_v38  ;;  %v645_v48 = vadd.f32 %v643_v50, %v628_v30  ;;  %v2452_v63 = vpop.permute.xlu0 %802  ;;  %v2465_v62 = vmul.f32 %v1986_v14, %v709_v22  ;;  %v656_v34 = vsel %vm219_vm1, %v654_v31, %v655_v35  ;;  %v2906_v50 = vld [vmem:[#allocation27_spill] sm:$0xff] }
 0x409   :  { %v825_v33 = vstv %s2355_s19  ;;  %v826_v51 = vstv %s2377_s13  ;;  %v885_v2 = vstv %s2381_s14  ;;  %v886_v5 = vstv %s2395_s15  ;;  %s2638_s19 = sld [smem:[#allocation2 + $0x2b]] }
 0x40a   :  { %v647_v57 = vpop.permute.xlu1 %646  ;;  %v752_v45 = vmul.f32 %v750_v7, %v2902_v15  ;;  %v2479_v53 = vmul.f32 %v2137_v47, %v751_v46  ;;  %v768_v9 = vmul.f32 %v767_v19, %v2904_v13  ;;  %v769_v18 = vmul.f32 %v767_v19, %v2905_v12  ;;  %v880_v7 = vpop.permute.xlu2 %879  ;;  %s2657_s13 = sld [smem:[#allocation2 + $0x5b]] }
 0x40b   :  { %v650_v44 = vsel %vm409_vm10, %v647_v57, %v2903_v27  ;;  %v651_v11 = vsel %vm409_vm10, %v2903_v27, %v647_v57  ;;  %v827_v17 = vsel %vm219_vm1, %v825_v33, %v826_v51  ;;  %v822_v31 = vsel %vm346_vm6, %v2402_v42, %v2906_v50  ;;  %v2907_v51 = vld [vmem:[#allocation28_spill] sm:$0xff]  ;;  %s2690_s14 = sld [smem:[#allocation2 + $0x2f]] }
 0x40c   :  { %v657_v16 = vmul.f32 %v656_v34, %v650_v44  ;;  %v658_v22 = vmul.f32 %v656_v34, %v651_v11  ;;  %v887_v35 = vsel %vm219_vm1, %v885_v2, %v886_v5  ;;  %v945_v19 = vstv %s2406_s12  ;;  %s2697_s15 = sld [smem:[#allocation2 + $0x60]] }
 0x40d   :  { %v821_v38 = vsel %vm346_vm6, %v2906_v50, %v2402_v42  ;;  %v946_v30 = vstv %s2416_s17  ;;  %v808_v28 = vstv %s2422_s16  ;;  %v809_v37 = vstv %s2430_s20  ;;  %s2706_s12 = sld [smem:[#allocation2 + $0x2e]] }
 0x40e   :  { %v659_v8 = vmul.f32 %v2176_v39, %v657_v16  ;;  %v660_v46 = vmul.f32 %v2179_v56, %v658_v22  ;;  %v1005_v36 = vstv %s2434_s21  ;;  %v1006_v34 = vstv %s2443_s22  ;;  %s2716_s17 = sld [smem:[#allocation2 + $0x5f]] }
 0x40f   :  { %v828_v33 = vmul.f32 %v827_v17, %v822_v31  ;;  %v881_v2 = vsel %vm409_vm10, %v2907_v51, %v880_v7  ;;  %v754_v57 = vmul.f32 %v2142_v29, %v752_v45  ;;  %v2524_v15 = vmul.f32 %v2176_v39, %v768_v9  ;;  %s2756_s16 = sld [smem:[#allocation2 + $0x30]] }
 0x410   :  { %v661_v5 = vadd.f32 %v659_v8, %v644_v10  ;;  %v662_v42 = vadd.f32 %v660_v46, %v645_v48  ;;  %v2527_v27 = vmul.f32 %v2179_v56, %v769_v18  ;;  %v829_v44 = vmul.f32 %v827_v17, %v821_v38  ;;  %v2529_v11 = vpop.permute.xlu0 %862  ;;  %s2762_s20 = sld [smem:[#allocation2 + $0x61]] }
 0x411   :  { %v791_v48 = vstv %s2469_s0  ;;  %v792_v12 = vstv %s2475_s3  ;;  %v888_v9 = vmul.f32 %v887_v35, %v881_v2  ;;  %v947_v18 = vsel %vm219_vm1, %v945_v19, %v946_v30 }
 0x412   :  { %v678_v13 = vadd.f32 %v2387_v20, %v661_v5  ;;  %v679_v10 = vadd.f32 %v2398_v26, %v662_v42  ;;  %v786_v45 = vpop.permute.xlu1 %785  ;;  %v810_v16 = vsel %vm219_vm1, %v808_v28, %v809_v37  ;;  %v2545_v20 = vsel %vm219_vm1, %v1005_v36, %v1006_v34  ;;  %v940_v8 = vpop.permute.xlu2 %939  ;;  %v2908_v36 = vld [vmem:[#allocation21_spill] sm:$0xff]  ;;  %v2911_v5 = vld [vmem:[#allocation30_spill] sm:$0xff] }
 0x413   :  { %v2550_v26 = vmul.f32 %v1981_v32, %v828_v33  ;;  %v882_v22 = vsel %vm409_vm10, %v880_v7, %v2907_v51  ;;  %v2560_v31 = vmul.f32 %v1986_v14, %v829_v44  ;;  %v793_v19 = vsel %vm219_vm1, %v791_v48, %v792_v12  ;;  %v2909_v51 = vld [vmem:[#allocation16_spill] sm:$0xff]  ;;  %v2912_v44 = vld [vmem:[#allocation29_spill] sm:$0xff] }
 0x414   :  { %v695_v17 = vadd.f32 %v2437_v52, %v678_v13  ;;  %v696_v50 = vadd.f32 %v2440_v23, %v679_v10  ;;  %v868_v38 = vstv %s2487_s23  ;;  %v869_v30 = vstv %s2491_s24 }
 0x415   :  { %v1065_v23 = vstv %s2502_s1  ;;  %v1066_v46 = vstv %s2511_s2  ;;  %v889_v28 = vmul.f32 %v887_v35, %v882_v22  ;;  %v2573_v37 = vmul.f32 %v2176_v39, %v888_v9  ;;  %v2910_v35 = vld [vmem:[#allocation31_spill] sm:$0xff] }
 0x416   :  { %v712_v7 = vadd.f32 %v2462_v60, %v695_v17  ;;  %v713_v52 = vadd.f32 %v2465_v62, %v696_v50  ;;  %v787_v34 = vsel %vm310_vm2, %v2908_v36, %v786_v45  ;;  %v788_v33 = vsel %vm310_vm2, %v786_v45, %v2908_v36 }
 0x417   :  { %v804_v60 = vsel %vm328_vm3, %v2909_v51, %v2452_v63  ;;  %v805_v62 = vsel %vm328_vm3, %v2452_v63, %v2909_v51  ;;  %v941_v13 = vsel %vm346_vm6, %v2912_v44, %v940_v8  ;;  %v942_v10 = vsel %vm346_vm6, %v940_v8, %v2912_v44 }
 0x418   :  { %v721_v2 = vadd.f32 %v2910_v35, %v712_v7  ;;  %v722_v42 = vadd.f32 %v2911_v5, %v713_v52  ;;  %v851_v48 = vstv %s2520_s26  ;;  %v852_v12 = vstv %s2531_s27  ;;  %v923_v51 = vpop.permute.xlu0 %922 }
 0x419   :  { %v794_v63 = vmul.f32 %v793_v19, %v788_v33  ;;  %v795_v22 = vmul.f32 %v793_v19, %v787_v34  ;;  %v811_v50 = vmul.f32 %v810_v16, %v805_v62  ;;  %v812_v7 = vmul.f32 %v810_v16, %v804_v60 }
 0x41a   :  { %v738_v45 = vadd.f32 %v2450_v3, %v721_v2  ;;  %v739_v9 = vadd.f32 %v2459_v24, %v722_v42  ;;  %v846_v17 = vpop.permute.xlu1 %845  ;;  %v870_v52 = vsel %vm219_vm1, %v868_v38, %v869_v30  ;;  %v928_v36 = vstv %s2537_s28  ;;  %v2913_v2 = vld [vmem:[#allocation22_spill] sm:$0xff]  ;;  %v2914_v42 = vld [vmem:[#allocation17_spill] sm:$0xff] }
 0x41b   :  { %v853_v3 = vsel %vm219_vm1, %v851_v48, %v852_v12  ;;  %v929_v24 = vstv %s2547_s29  ;;  %v948_v19 = vmul.f32 %v947_v18, %v942_v10  ;;  %v949_v34 = vmul.f32 %v947_v18, %v941_v13 }
 0x41c   :  { %v755_v8 = vadd.f32 %v2479_v53, %v738_v45  ;;  %v756_v35 = vadd.f32 %v754_v57, %v739_v9  ;;  %v911_v33 = vstv %s2557_s7  ;;  %v912_v16 = vstv %s2566_s8  ;;  %v1000_v9 = vpop.permute.xlu2 %999 }
 0x41d   :  { %v796_v30 = vmul.f32 %v1958_v25, %v794_v63  ;;  %v797_v62 = vmul.f32 %v1907_v21, %v795_v22  ;;  %v813_v53 = vmul.f32 %v1928_v40, %v811_v50  ;;  %v814_v57 = vmul.f32 %v1933_v41, %v812_v7 }
 0x41e   :  { %v772_v60 = vadd.f32 %v2524_v15, %v755_v8  ;;  %v773_v38 = vadd.f32 %v2527_v27, %v756_v35  ;;  %v847_v18 = vsel %vm373_vm5, %v2913_v2, %v846_v17  ;;  %v848_v15 = vsel %vm373_vm5, %v846_v17, %v2913_v2 }
 0x41f   :  { %v864_v44 = vsel %vm391_vm7, %v2914_v42, %v2529_v11  ;;  %v865_v13 = vsel %vm391_vm7, %v2529_v11, %v2914_v42  ;;  %v891_v10 = vmul.f32 %v2179_v56, %v889_v28  ;;  %v2643_v48 = vsel %vm219_vm1, %v1065_v23, %v1066_v46 }
 0x420   :  { %v798_v27 = vadd.f32 %v796_v30, %v772_v60  ;;  %v799_v5 = vadd.f32 %v797_v62, %v773_v38  ;;  %v930_v12 = vsel %vm219_vm1, %v928_v36, %v929_v24  ;;  %v913_v45 = vsel %vm219_vm1, %v911_v33, %v912_v16  ;;  %v2915_v24 = vld [vmem:[#allocation18_spill] sm:$0xff]  ;;  %v2916_v33 = vld [vmem:[#allocation24_spill] sm:$0xff]  ;;  %v2917_v60 = vld [vmem:[#allocation37_spill] sm:$0xff] }
 0x421   :  { %v854_v22 = vmul.f32 %v853_v3, %v847_v18  ;;  %v855_v17 = vmul.f32 %v853_v3, %v848_v15  ;;  %v2654_v23 = vmul.f32 %v1981_v32, %v948_v19  ;;  %v871_v46 = vmul.f32 %v870_v52, %v864_v44  ;;  %v2918_v38 = vld [vmem:[#allocation38_spill] sm:$0xff]  ;;  %v2919_v44 = vld [vmem:[#allocation33_spill] sm:$0xff] }
 0x422   :  { %v815_v11 = vadd.f32 %v813_v53, %v798_v27  ;;  %v816_v63 = vadd.f32 %v814_v57, %v799_v5  ;;  %v906_v50 = vpop.permute.xlu1 %905  ;;  %v872_v28 = vmul.f32 %v870_v52, %v865_v13  ;;  %v988_v7 = vstv %s2604_s25 }
 0x423   :  { %v2660_v36 = vmul.f32 %v1986_v14, %v949_v34  ;;  %v989_v3 = vstv %s2610_s11  ;;  %v924_v19 = vsel %vm328_vm3, %v2915_v24, %v923_v51  ;;  %v925_v52 = vsel %vm328_vm3, %v923_v51, %v2915_v24 }
 0x424   :  { %v832_v8 = vadd.f32 %v2550_v26, %v815_v11  ;;  %v833_v35 = vadd.f32 %v2560_v31, %v816_v63  ;;  %v907_v16 = vsel %vm310_vm2, %v2916_v33, %v906_v50  ;;  %v908_v34 = vsel %vm310_vm2, %v906_v50, %v2916_v33  ;;  %v983_v26 = vpop.permute.xlu0 %982 }
 0x425   :  { %v856_v62 = vmul.f32 %v2022_v55, %v854_v22  ;;  %v857_v53 = vmul.f32 %v2027_v49, %v855_v17  ;;  %v873_v57 = vmul.f32 %v2137_v47, %v871_v46  ;;  %v874_v51 = vmul.f32 %v2142_v29, %v872_v28 }
 0x426   :  { %v841_v31 = vadd.f32 %v2917_v60, %v832_v8  ;;  %v842_v30 = vadd.f32 %v2918_v38, %v833_v35  ;;  %v971_v2 = vstv %s2618_s18  ;;  %v972_v18 = vstv %s2628_s10  ;;  %v2921_v38 = vld [vmem:[#allocation19_spill] sm:$0xff] }
 0x427   :  { %v914_v5 = vmul.f32 %v913_v45, %v908_v34  ;;  %v915_v42 = vmul.f32 %v913_v45, %v907_v16  ;;  %v1001_v13 = vsel %vm409_vm10, %v2919_v44, %v1000_v9  ;;  %v931_v11 = vmul.f32 %v930_v12, %v925_v52  ;;  %v2920_v34 = vld [vmem:[#allocation26_spill] sm:$0xff] }
 0x428   :  { %v858_v15 = vadd.f32 %v856_v62, %v841_v31  ;;  %v859_v27 = vadd.f32 %v857_v53, %v842_v30  ;;  %v932_v63 = vmul.f32 %v930_v12, %v924_v19  ;;  %v990_v22 = vsel %vm219_vm1, %v988_v7, %v989_v3  ;;  %v1060_v19 = vpop.permute.xlu2 %1059 }
 0x429   :  { %v1002_v17 = vsel %vm409_vm10, %v1000_v9, %v2919_v44  ;;  %v973_v45 = vsel %vm219_vm1, %v971_v2, %v972_v18  ;;  %v1048_v8 = vstv %s2638_s19  ;;  %v1049_v35 = vstv %s2649_s6 }
 0x42a   :  { %v875_v50 = vadd.f32 %v873_v57, %v858_v15  ;;  %v876_v46 = vadd.f32 %v874_v51, %v859_v27  ;;  %v966_v28 = vpop.permute.xlu1 %965  ;;  %v1031_v12 = vstv %s2651_s9  ;;  %v1032_v24 = vstv %s2657_s13 }
 0x42b   :  { %v916_v52 = vmul.f32 %v1958_v25, %v914_v5  ;;  %v917_v9 = vmul.f32 %v1907_v21, %v915_v42  ;;  %v933_v33 = vmul.f32 %v1928_v40, %v931_v11  ;;  %v934_v16 = vmul.f32 %v1933_v41, %v932_v63 }
 0x42c   :  { %v892_v7 = vadd.f32 %v2573_v37, %v875_v50  ;;  %v893_v3 = vadd.f32 %v891_v10, %v876_v46  ;;  %v967_v60 = vsel %vm373_vm5, %v2920_v34, %v966_v28  ;;  %v968_v31 = vsel %vm373_vm5, %v966_v28, %v2920_v34  ;;  %v1043_v18 = vpop.permute.xlu0 %1042 }
 0x42d   :  { %v984_v30 = vsel %vm391_vm7, %v2921_v38, %v983_v26  ;;  %v985_v62 = vsel %vm391_vm7, %v983_v26, %v2921_v38  ;;  %v1008_v53 = vmul.f32 %v2545_v20, %v1001_v13  ;;  %v1009_v57 = vmul.f32 %v2545_v20, %v1002_v17 }
 0x42e   :  { %v918_v37 = vadd.f32 %v916_v52, %v892_v7  ;;  %v919_v10 = vadd.f32 %v917_v9, %v893_v3  ;;  %v1061_v51 = vsel %vm346_vm6, %v2404_v6, %v1060_v19  ;;  %v1050_v2 = vsel %vm219_vm1, %v1048_v8, %v1049_v35 }
 0x42f   :  { %v974_v5 = vmul.f32 %v973_v45, %v967_v60  ;;  %v975_v42 = vmul.f32 %v973_v45, %v968_v31  ;;  %v1062_v26 = vsel %vm346_vm6, %v1060_v19, %v2404_v6  ;;  %v991_v44 = vmul.f32 %v990_v22, %v984_v30 }
 0x430   :  { %v935_v15 = vadd.f32 %v933_v33, %v918_v37  ;;  %v936_v27 = vadd.f32 %v934_v16, %v919_v10  ;;  %v992_v13 = vmul.f32 %v990_v22, %v985_v62  ;;  %v1033_v20 = vsel %vm219_vm1, %v1031_v12, %v1032_v24 }
 0x431   :  { %v1108_v50 = vstv %s2690_s14  ;;  %v1109_v46 = vstv %s2697_s15  ;;  %v1044_v45 = vsel %vm328_vm3, %v2271_v58, %v1043_v18  ;;  %v1045_v6 = vsel %vm328_vm3, %v1043_v18, %v2271_v58 }
 0x432   :  { %v952_v11 = vadd.f32 %v2654_v23, %v935_v15  ;;  %v953_v63 = vadd.f32 %v2660_v36, %v936_v27  ;;  %v1026_v17 = vpop.permute.xlu1 %1025  ;;  %v976_v8 = vmul.f32 %v2022_v55, %v974_v5  ;;  %v977_v35 = vmul.f32 %v2027_v49, %v975_v42 }
 0x433   :  { %v1027_v22 = vsel %vm310_vm2, %v2333_v59, %v1026_v17  ;;  %v1028_v23 = vsel %vm310_vm2, %v1026_v17, %v2333_v59  ;;  %v993_v58 = vmul.f32 %v2137_v47, %v991_v44  ;;  %v994_v12 = vmul.f32 %v2142_v29, %v992_v13 }
 0x434   :  { %v961_v36 = vadd.f32 %v2447_v61, %v952_v11  ;;  %v962_v28 = vadd.f32 %v2456_v1, %v953_v63  ;;  %v1091_v24 = vstv %s2706_s12  ;;  %v1092_v19 = vstv %s2716_s17  ;;  %v1103_v62 = vpop.permute.xlu0 %1102 }
 0x435   :  { %v1034_v7 = vmul.f32 %v1033_v20, %v1028_v23  ;;  %v1035_v3 = vmul.f32 %v1033_v20, %v1027_v22  ;;  %v1051_v52 = vmul.f32 %v1050_v2, %v1045_v6  ;;  %v1052_v1 = vmul.f32 %v1050_v2, %v1044_v45  ;;  %v2924_v45 = vld [vmem:[#allocation15_spill] sm:$0xff] }
 0x436   :  { %v978_v59 = vadd.f32 %v976_v8, %v961_v36  ;;  %v979_v61 = vadd.f32 %v977_v35, %v962_v28  ;;  %v2922_v9 = vstv %s1939_s5  ;;  %v2923_v33 = vstv %s1923_s30  ;;  %v2925_v22 = vld [vmem:[#allocation23_spill] sm:$0xff] }
 0x437   :  { %v1078_v16 = vsel %vm219_vm1, %v2923_v33, %v2922_v9  ;;  %v1010_v34 = vmul.f32 %v2176_v39, %v1008_v53  ;;  %v1011_v60 = vmul.f32 %v2179_v56, %v1009_v57  ;;  %v1068_v10 = vmul.f32 %v2643_v48, %v1062_v26 }
 0x438   :  { %v995_v31 = vadd.f32 %v993_v58, %v978_v59  ;;  %v996_v37 = vadd.f32 %v994_v12, %v979_v61  ;;  %v1069_v38 = vmul.f32 %v2643_v48, %v1061_v51  ;;  %v1110_v30 = vsel %vm219_vm1, %v1108_v50, %v1109_v46 }
 0x439   :  { %v1093_v2 = vsel %vm219_vm1, %v1091_v24, %v1092_v19  ;;  %v1036_v53 = vmul.f32 %v1958_v25, %v1034_v7  ;;  %v1037_v57 = vmul.f32 %v1907_v21, %v1035_v3  ;;  %v1053_v5 = vmul.f32 %v1928_v40, %v1051_v52 }
 0x43a   :  { %v1012_v18 = vadd.f32 %v1010_v34, %v995_v31  ;;  %v1013_v15 = vadd.f32 %v1011_v60, %v996_v37  ;;  %v1086_v27 = vpop.permute.xlu1 %1085  ;;  %v1054_v48 = vmul.f32 %v1933_v41, %v1052_v1  ;;  %v1104_v25 = vsel %vm391_vm7, %v2331_v43, %v1103_v62 }
 0x43b   :  { %v1087_v51 = vsel %vm373_vm5, %v2383_v4, %v1086_v27  ;;  %v1088_v42 = vsel %vm373_vm5, %v1086_v27, %v2383_v4  ;;  %v1105_v21 = vsel %vm391_vm7, %v1103_v62, %v2331_v43  ;;  %v1070_v40 = vmul.f32 %v1981_v32, %v1068_v10  ;;  %v1120_v32 = vpop.permute.xlu2 %1119 }
 0x43c   :  { %v1038_v26 = vadd.f32 %v1036_v53, %v1012_v18  ;;  %v1039_v44 = vadd.f32 %v1037_v57, %v1013_v15  ;;  %v1071_v41 = vmul.f32 %v1986_v14, %v1069_v38  ;;  %v1125_v13 = vstv %s2756_s16 }
 0x43d   :  { %v1126_v20 = vstv %s2762_s20  ;;  %v1094_v17 = vmul.f32 %v1093_v2, %v1087_v51  ;;  %v1095_v4 = vmul.f32 %v1093_v2, %v1088_v42  ;;  %v1111_v50 = vmul.f32 %v1110_v30, %v1104_v25 }
 0x43e   :  { %v1055_v11 = vadd.f32 %v1053_v5, %v1038_v26  ;;  %v1056_v63 = vadd.f32 %v1054_v48, %v1039_v44  ;;  %v1112_v46 = vmul.f32 %v1110_v30, %v1105_v21  ;;  %v1079_v6 = vmul.f32 %v1078_v16, %v2924_v45  ;;  %v2927_v45 = vld [vmem:[#allocation6_spill] sm:$0xff] }
 0x43f   :  { %v1080_v23 = vmul.f32 %v1078_v16, %v2925_v22  ;;  %v1127_v43 = vsel %vm219_vm1, %v1125_v13, %v1126_v20  ;;  %v1096_v35 = vmul.f32 %v2022_v55, %v1094_v17  ;;  %v1097_v58 = vmul.f32 %v2027_v49, %v1095_v4  ;;  %v2926_v4 = vld [vmem:[#allocation5_spill] sm:$0xff] }
 0x440   :  { %v1072_v36 = vadd.f32 %v1070_v40, %v1055_v11  ;;  %v1073_v28 = vadd.f32 %v1071_v41, %v1056_v63  ;;  %v1113_v24 = vmul.f32 %v2137_v47, %v1111_v50  ;;  %v1114_v19 = vmul.f32 %v2142_v29, %v1112_v46 }
 0x442   :  { %v1081_v8 = vadd.f32 %v1079_v6, %v1072_v36  ;;  %v1082_v14 = vadd.f32 %v1080_v23, %v1073_v28  ;;  %v1118_v12 = vpop.permute.xlu1 %1117 }
 0x443   :  { %v1121_v59 = vsel %vm409_vm10, %v1118_v12, %v1120_v32  ;;  %v1122_v61 = vsel %vm409_vm10, %v1120_v32, %v1118_v12 }
 0x444   :  { %v1098_v0 = vadd.f32 %v1096_v35, %v1081_v8  ;;  %v1099_v7 = vadd.f32 %v1097_v58, %v1082_v14  ;;  %v1128_v3 = vmul.f32 %v1127_v43, %v1121_v59  ;;  %v1129_v52 = vmul.f32 %v1127_v43, %v1122_v61 }
 0x446   :  { %v1115_v1 = vadd.f32 %v1113_v24, %v1098_v0  ;;  %v1116_v9 = vadd.f32 %v1114_v19, %v1099_v7  ;;  %v1130_v55 = vmul.f32 %v2176_v39, %v1128_v3  ;;  %v1131_v49 = vmul.f32 %v2179_v56, %v1129_v52 }
 0x448   :  { %v1132_v33 = vadd.f32 %v1130_v55, %v1115_v1  ;;  %v1133_v47 = vadd.f32 %v1131_v49, %v1116_v9 }
 0x44a   :  { %v1136_v16 = vrot.slane %v1132_v33, 2  ;;  %v1137_v29 = vrot.slane %v1133_v47, 2 }
 0x44c   :  { %v1140_v34 = vadd.f32 %v1136_v16, %v1132_v33  ;;  %v1141_v60 = vadd.f32 %v1137_v29, %v1133_v47 }
 0x44e   :  { %v1316_v31 = vmul.f32 -1.442695, %v1140_v34  ;;  %v1317_v37 = vmul.f32 -1.442695, %v1141_v60 }
 0x450   :  { %1345 = vpow2.f32 %v1316_v31 }
 0x451   :  { %1347 = vpow2.f32 %v1317_v37 }
 0x456   :  { %v1346_v54 = vpop.eup %1345 }
 0x457   :  { %v1348_v10 = vpop.eup %1347  ;;  %v1148_v38 = vadd.f32 1.0, %v1346_v54 }
 0x458   :  { %v1149_v30 = vadd.f32 1.0, %v1348_v10 }
 0x459   :  { %1349 = vrcp.f32 %v1148_v38  ;;  %v1161_v15 = vand.u32 2147483648, %v1148_v38  ;;  %v1159_v27 = vand.u32 2147483647, %v1148_v38  ;;  %vm1155_vm5 = vweird.f32 %v1148_v38 }
 0x45a   :  { %1351 = vrcp.f32 %v1149_v30  ;;  %v1176_v5 = vand.u32 2147483648, %v1149_v30  ;;  %v1174_v51 = vand.u32 2147483647, %v1149_v30  ;;  %vm1170_vm7 = vweird.f32 %v1149_v30 }
 0x45b   :  { %v1162_v26 = vor.u32 1.1754944e-38, %v1161_v15  ;;  %vm1160_vm10 = vcmp.eq.f32.partialorder %v1159_v27, 8.507059e+37 }
 0x45c   :  { %v1177_v21 = vor.u32 1.1754944e-38, %v1176_v5  ;;  %vm1175_vm13 = vcmp.eq.f32.partialorder %v1174_v51, 8.507059e+37 }
 0x45f   :  { %v1350_v62 = vpop.eup %1349 }
 0x460   :  { %v1352_v39 = vpop.eup %1351  ;;  %v1151_v2 = vmul.f32 %v1350_v62, %v1148_v38  ;;  %vm1156_vm2 = vweird.f32 %v1350_v62 }
 0x461   :  { %v1166_v56 = vmul.f32 %v1352_v39, %v1149_v30  ;;  %vm1171_vm3 = vweird.f32 %v1352_v39  ;;  %vm1157_vm6 = vmor %vm1155_vm5, %vm1156_vm2 }
 0x462   :  { %v1152_v18 = vsub.f32 1.0, %v1151_v2  ;;  %vm1172_vm1 = vmor %vm1170_vm7, %vm1171_vm3 }
 0x463   :  { %v1167_v53 = vsub.f32 1.0, %v1166_v56 }
 0x464   :  { %v1153_v57 = vmul.f32 %v1350_v62, %v1152_v18 }
 0x465   :  { %v1168_v48 = vmul.f32 %v1352_v39, %v1167_v53 }
 0x466   :  { %v1154_v42 = vadd.f32 %v1350_v62, %v1153_v57 }
 0x467   :  { %v1169_v44 = vadd.f32 %v1352_v39, %v1168_v48 }
 0x468   :  { %v1158_v25 = vsel %vm1157_vm6, %v1350_v62, %v1154_v42 }
 0x469   :  { %v1163_v40 = vsel %vm1160_vm10, %v1162_v26, %v1158_v25  ;;  %v1173_v41 = vsel %vm1172_vm1, %v1352_v39, %v1169_v44 }
 0x46a   :  { %v1178_v13 = vsel %vm1175_vm13, %v1177_v21, %v1173_v41  ;;  %v1180_v20 = vperm.slane %v1163_v40, 0  ;;  %v1184_v11 = vperm.slane %v1163_v40, 1 }
 0x46b   :  { %v1181_v63 = vperm.slane %v1178_v13, 0  ;;  %v1185_v17 = vperm.slane %v1178_v13, 1 }
 0x46c   :  { %v1182_v50 = vmul.f32 %v1180_v20, %v2926_v4  ;;  %v1186_v46 = vmul.f32 %v1184_v11, %v2926_v4 }
 0x46d   :  { %v1183_v6 = vmul.f32 %v1181_v63, %v2927_v45  ;;  %v1187_v22 = vmul.f32 %v1185_v17, %v2927_v45 }
 0x46e   :  { %v1188_v23 = vsel %vm134_vm9, %v1182_v50, %v1186_v46 }
 0x46f   :  { %v1189_v36 = vsel %vm134_vm9, %v1183_v6, %v1187_v22  ;;  %1190 = vst [vmem:[%s2828_s4] sm:$0xff] %v1188_v23 }
 0x470   :  { %1191 = vst [vmem:[%s2828_s4 + $0x8] sm:$0xff] %v1189_v36 }
 0x471   :  { %1196 = vsyncpa [#allocation3], 1 }

</bundles_post_ra>
